<compile_context>
chip_gen: v5e
topology: v5e:2x2
jax: 0.10.0
libtpu: 0.0.40
codegen_flags: <defaults>
</compile_context>

<pallas_src>
import jax
import jax.numpy as jnp
from jax import lax
from jax.experimental import pallas as pl
from jax.experimental.pallas import tpu as pltpu

START_TAG = "<START>"
STOP_TAG = "<STOP>"
tag_to_ix = {
    "O": 0, "B-geo-loc": 1, "B-facility": 2, "I-facility": 3, "B-movie": 4,
    "I-movie": 5, "B-company": 6, "B-product": 7, "B-person": 8,
    "B-sportsteam": 9, "I-sportsteam": 10, "I-product": 11, "B-other": 12,
    "I-other": 13, "I-company": 14, "I-person": 15, "I-geo-loc": 16,
    "B-tvshow": 17, "B-musicartist": 18, "I-musicartist": 19, "I-tvshow": 20,
    START_TAG: 21, STOP_TAG: 22,
}
TAGSET = len(tag_to_ix)           # 23
START_IDX = tag_to_ix[START_TAG]  # 21
STOP_IDX = tag_to_ix[STOP_TAG]    # 22


# ----------------------------------------------------------------------------
# Fused kernel: BiLSTM + hidden2tag + Viterbi DP
# outputs: backpointers (T, K) int32, terminal scores (1, K) float32
# ----------------------------------------------------------------------------
def bilstm_crf_kernel(emb_ref, wih_ref, b_ref, whh_ref, h0_ref, c0_ref,
                      wtag_ref, btag_ref, trans_ref, trans_stop_ref,
                      bptrs_ref, term_ref,
                      x_ref, h_ref):
    T = emb_ref.shape[0]
    G = wih_ref.shape[1]          # 8H  (fused gate width, both directions)
    H2 = G // 4                   # 2H  (concatenated hidden width)
    H = H2 // 2
    K = trans_ref.shape[0]

    # ---- phase 1: hoisted input projection (one MXU matmul for the whole sequence) ----
    x_ref[...] = (jnp.dot(emb_ref[...], wih_ref[...],
                          preferred_element_type=jnp.float32) + b_ref[...])

    # ---- phase 2: fwd + bwd recurrence in one fully-unrolled loop ----
    # gate layout along the 8H axis: [i | f | o | g], each 2H wide = [fwd H | bwd H]
    lane = lax.broadcasted_iota(jnp.int32, (1, G), 1)
    fwd_mask = (lane % H2) < H            # True on forward-direction lanes

    whh = whh_ref[...]                    # (2H, 8H), block-diagonal in direction
    h = h0_ref[...]                       # (1, 2H) = [h_fwd | h_bwd]
    c = c0_ref[...]                       # (1, 2H) = [c_fwd | c_bwd]

    for s in range(T):                    # T is small & static -> full unroll
        r = T - 1 - s                     # fwd consumes timestep s, bwd timestep r
        xrow = jnp.where(fwd_mask, x_ref[s:s + 1, :], x_ref[r:r + 1, :])
        z = xrow + jnp.dot(h, whh, preferred_element_type=jnp.float32)
        sig = jax.nn.sigmoid(z[:, 0:3 * H2])      # i, f, o (both directions): 1 EUP push
        g_g = jnp.tanh(z[:, 3 * H2:4 * H2])       # g       (both directions): 1 EUP push
        i_g = sig[:, 0:H2]
        f_g = sig[:, H2:2 * H2]
        o_g = sig[:, 2 * H2:3 * H2]
        c = f_g * c + i_g * g_g
        h = o_g * jnp.tanh(c)
        h_ref[s:s + 1, 0:H] = h[:, 0:H]           # forward hidden at time s
        h_ref[r:r + 1, H:H2] = h[:, H:H2]         # backward hidden at time r

    # ---- phase 3: hidden2tag ----
    feats = (jnp.dot(h_ref[...], wtag_ref[...],
                     preferred_element_type=jnp.float32) + btag_ref[...])   # (T, K)

    # ---- phase 4: Viterbi DP (fully unrolled), emission added after the max ----
    trans = trans_ref[...]                                    # (K, K) [next, prev]
    lane_k = lax.broadcasted_iota(jnp.int32, (1, K), 1)
    fv = jnp.where(lane_k == START_IDX, 0.0, -10000.0).astype(jnp.float32)
    ids = lax.broadcasted_iota(jnp.int32, (K, K), 1)

    for t in range(T):
        mat = trans + fv                                      # broadcast over next-tag rows
        vvars = jnp.max(mat, axis=1)                          # (K,) single lane reduction
        masked = jnp.where(mat == vvars[:, None], ids, K)     # first-index argmax over prev
        best = jnp.min(masked, axis=1).astype(jnp.int32)      # (K,)
        bptrs_ref[t:t + 1, :] = best[None, :]
        fv = vvars[None, :] + feats[t:t + 1, :]               # reuse the max for forward var

    term_ref[...] = fv + trans_stop_ref[...]


# ----------------------------------------------------------------------------
# Wrapper: one jitted computation (gather + fused kernel + scan traceback)
# ----------------------------------------------------------------------------
def _forward_impl(sentence, params):
    # TODO(synk): embedding gather kept as an XLA gather inside the jitted wrapper;
    # fusing it via scalar-prefetch DMA would save one HBM op but adds risk for ~0 gain here.
    emb = params["embedding"][sentence].astype(jnp.float32)   # (T, E)
    T = emb.shape[0]
    K = TAGSET
    G = params["wih_fused"].shape[1]   # 8H
    H2 = G // 4                        # 2H

    vmem = pl.BlockSpec(memory_space=pltpu.MemorySpace.VMEM)

    bptrs, terminal = pl.pallas_call(
        bilstm_crf_kernel,
        out_shape=(jax.ShapeDtypeStruct((T, K), jnp.int32),
                   jax.ShapeDtypeStruct((1, K), jnp.float32)),
        in_specs=[vmem] * 10,
        out_specs=(vmem, vmem),
        scratch_shapes=[pltpu.VMEM((T, G), jnp.float32),    # precomputed input projections
                        pltpu.VMEM((T, H2), jnp.float32)],  # [h_fwd | h_bwd] per timestep
    )(emb,
      params["wih_fused"], params["b_fused"], params["whh_blk"],
      params["h0"], params["c0"],
      params["wtag_T"], params["btag"],
      params["transitions"], params["trans_stop_row"])

    # decode terminal + backpointer traceback inside the same jit (lax.scan, 1 dispatch)
    best_tag_id = jnp.argmax(terminal[0]).astype(jnp.int32)
    path_score = terminal[0, best_tag_id]

    def step(cur, bp_row):
        prev = bp_row[cur]
        return prev, prev

    start, prevs = lax.scan(step, best_tag_id, bptrs[::-1])
    tag_seq = jnp.concatenate([prevs[:-1][::-1], best_tag_id[None]])
    return path_score, tag_seq, start


bilstm_crf_forward = jax.jit(_forward_impl)


# ----------------------------------------------------------------------------
# Deterministic parameter construction (shapes from the module's __init__),
# then repack into the fused layouts the kernel expects.
# ----------------------------------------------------------------------------
def init_params(key, vocab_size, embedding_dim, hidden_dim):
    H = hidden_dim // 2
    K = TAGSET
    ks = jax.random.split(key, 14)

    def uni(k, shape, bound):
        return jax.random.uniform(k, shape, jnp.float32, -bound, bound)

    b_lstm = 1.0 / float(H) ** 0.5
    b_lin = 1.0 / float(hidden_dim) ** 0.5

    emb = jax.random.normal(ks[0], (vocab_size, embedding_dim), jnp.float32)

    # torch LSTM weights, gate row order [i, f, g, o]
    wih_f = uni(ks[1], (4 * H, embedding_dim), b_lstm)
    whh_f = uni(ks[2], (4 * H, H), b_lstm)
    bih_f = uni(ks[3], (4 * H,), b_lstm)
    bhh_f = uni(ks[4], (4 * H,), b_lstm)
    wih_b = uni(ks[5], (4 * H, embedding_dim), b_lstm)
    whh_b = uni(ks[6], (4 * H, H), b_lstm)
    bih_b = uni(ks[7], (4 * H,), b_lstm)
    bhh_b = uni(ks[8], (4 * H,), b_lstm)

    wtag = uni(ks[9], (K, hidden_dim), b_lin)
    btag = uni(ks[10], (K,), b_lin)

    transitions = jax.random.normal(ks[11], (K, K), jnp.float32)
    transitions = transitions.at[START_IDX, :].set(-10000.0)
    transitions = transitions.at[:, STOP_IDX].set(-10000.0)

    h0 = jax.random.normal(ks[12], (2, H), jnp.float32)   # (num_dirs, H), batch=1 squeezed
    c0 = jax.random.normal(ks[13], (2, H), jnp.float32)

    # --- repack for the fused kernel ---------------------------------------
    # columns of the (E/2H, 4H) transposed weights are in torch order [i, f, g, o];
    # fused layout is gate-type-major [i | f | o | g], each 2H wide = [fwd H | bwd H].
    def fuse_gates(mf, mb):
        parts = []
        for gidx in (0, 1, 3, 2):          # i, f, o, g  (o and g swapped vs torch order)
            parts.append(mf[..., gidx * H:(gidx + 1) * H])
            parts.append(mb[..., gidx * H:(gidx + 1) * H])
        return jnp.concatenate(parts, axis=-1)

    wih_fused = fuse_gates(jnp.asarray(wih_f.T), jnp.asarray(wih_b.T))        # (E, 8H)
    b_fused = fuse_gates((bih_f + bhh_f)[None, :], (bih_b + bhh_b)[None, :])  # (1, 8H)
    zeros_h = jnp.zeros((H, 4 * H), jnp.float32)
    whh_blk = jnp.concatenate(                                                # (2H, 8H)
        [fuse_gates(jnp.asarray(whh_f.T), zeros_h),
         fuse_gates(zeros_h, jnp.asarray(whh_b.T))], axis=0)

    return dict(
        embedding=emb,
        wih_fused=wih_fused, b_fused=b_fused, whh_blk=whh_blk,
        h0=jnp.concatenate([h0[0], h0[1]])[None, :],   # (1, 2H) = [fwd | bwd]
        c0=jnp.concatenate([c0[0], c0[1]])[None, :],
        wtag_T=jnp.asarray(wtag.T), btag=btag[None, :],
        transitions=transitions,
        trans_stop_row=transitions[STOP_IDX][None, :],
    )


if __name__ == "__main__":
    key = jax.random.PRNGKey(0)
    k_param, k_sent = jax.random.split(key)

    vocab_size = 100
    embedding_dim = 50   # glove.6B.50d
    hidden_dim = 32
    T = 8                # sentence length

    params = init_params(k_param, vocab_size, embedding_dim, hidden_dim)
    sentence = jax.random.randint(k_sent, (T,), 0, vocab_size)

    path_score, tag_seq, start = bilstm_crf_forward(sentence, params)
    jax.block_until_ready((path_score, tag_seq, start))

    assert int(start) == START_IDX          # same assertion as the PyTorch _viterbi_decode
    assert tag_seq.shape == (T,)
    assert bool(jnp.isfinite(path_score))
    print("KERNEL_OK")
</pallas_src>

<mosaic_0001>
module attributes {stable_mosaic.version = 11 : i64} {
  func.func @bilstm_crf_kernel(%arg0: memref<8x50xf32, #tpu.memory_space<vmem>>, %arg1: memref<50x128xf32, #tpu.memory_space<vmem>>, %arg2: memref<1x128xf32, #tpu.memory_space<vmem>>, %arg3: memref<32x128xf32, #tpu.memory_space<vmem>>, %arg4: memref<1x32xf32, #tpu.memory_space<vmem>>, %arg5: memref<1x32xf32, #tpu.memory_space<vmem>>, %arg6: memref<32x23xf32, #tpu.memory_space<vmem>>, %arg7: memref<1x23xf32, #tpu.memory_space<vmem>>, %arg8: memref<23x23xf32, #tpu.memory_space<vmem>>, %arg9: memref<1x23xf32, #tpu.memory_space<vmem>>, %arg10: memref<8x23xi32, #tpu.memory_space<vmem>>, %arg11: memref<1x23xf32, #tpu.memory_space<vmem>>, %arg12: memref<8x128xf32, #tpu.memory_space<vmem>>, %arg13: memref<8x32xf32, #tpu.memory_space<vmem>>) attributes {dimension_semantics = [], scalar_prefetch = 0 : i64, scratch_operands = 2 : i64, tpu.core_type = #tpu.core_type<tc>} {
    %c0 = arith.constant 0 : index
    %c0_0 = arith.constant 0 : index
    %0 = vector.load %arg0[%c0, %c0_0] : memref<8x50xf32, #tpu.memory_space<vmem>>, vector<8x50xf32>
    %c0_1 = arith.constant 0 : index
    %c0_2 = arith.constant 0 : index
    %1 = vector.load %arg1[%c0_1, %c0_2] : memref<50x128xf32, #tpu.memory_space<vmem>>, vector<50x128xf32>
    %cst = arith.constant dense<0.000000e+00> : vector<8x128xf32>
    %2 = tpu.matmul %0, %1, %cst {dimension_numbers = #tpu.dot_dimension_numbers<[1], [0], [0], [1], [0, 0, 1, 1], [], []>} : vector<8x50xf32>, vector<50x128xf32>, vector<8x128xf32> -> vector<8x128xf32>
    %c0_3 = arith.constant 0 : index
    %c0_4 = arith.constant 0 : index
    %3 = vector.load %arg2[%c0_3, %c0_4] : memref<1x128xf32, #tpu.memory_space<vmem>>, vector<1x128xf32>
    %4 = vector.broadcast %3 : vector<1x128xf32> to vector<8x128xf32>
    %5 = arith.addf %2, %4 : vector<8x128xf32>
    %c0_5 = arith.constant 0 : index
    %c0_6 = arith.constant 0 : index
    %6 = vector.load %arg12[%c0_5, %c0_6] : memref<8x128xf32, #tpu.memory_space<vmem>>, vector<8x128xf32>
    tpu.vector_store %arg12[%c0_5, %c0_6], %5 {strides = array<i32>} : memref<8x128xf32, #tpu.memory_space<vmem>>, vector<8x128xf32>,
    %7 = tpu.iota {dimensions = array<i32: 1>} : vector<1x128xi32>
    %c32_i32 = arith.constant 32 : i32
    %c0_i32 = arith.constant 0 : i32
    %8 = arith.cmpi eq, %c32_i32, %c0_i32 : i32
    %c1_i32 = arith.constant 1 : i32
    %9 = arith.select %8, %c1_i32, %c32_i32 : i32
    %10 = vector.broadcast %9 : i32 to vector<1x128xi32>
    %11 = arith.remsi %7, %10 : vector<1x128xi32>
    %c0_i32_7 = arith.constant 0 : i32
    %12 = vector.broadcast %c0_i32_7 : i32 to vector<1x128xi32>
    %13 = arith.cmpi ne, %11, %12 : vector<1x128xi32>
    %c0_i32_8 = arith.constant 0 : i32
    %14 = vector.broadcast %c0_i32_8 : i32 to vector<1x128xi32>
    %15 = arith.cmpi slt, %11, %14 : vector<1x128xi32>
    %c0_i32_9 = arith.constant 0 : i32
    %16 = arith.cmpi slt, %9, %c0_i32_9 : i32
    %17 = vector.broadcast %16 : i1 to vector<1x128xi1>
    %18 = vector.broadcast %17 : vector<1x128xi1> to vector<1x128xi1>
    %19 = arith.xori %15, %18 : vector<1x128xi1>
    %20 = arith.andi %19, %13 : vector<1x128xi1>
    %21 = vector.broadcast %9 : i32 to vector<1x128xi32>
    %22 = arith.addi %11, %21 : vector<1x128xi32>
    %23 = arith.select %20, %22, %11 : vector<1x128xi1>, vector<1x128xi32>
    %c16_i32 = arith.constant 16 : i32
    %24 = vector.broadcast %c16_i32 : i32 to vector<1x128xi32>
    %25 = arith.cmpi slt, %23, %24 : vector<1x128xi32>
    %c0_10 = arith.constant 0 : index
    %c0_11 = arith.constant 0 : index
    %26 = vector.load %arg3[%c0_10, %c0_11] : memref<32x128xf32, #tpu.memory_space<vmem>>, vector<32x128xf32>
    %c0_12 = arith.constant 0 : index
    %c0_13 = arith.constant 0 : index
    %27 = vector.load %arg4[%c0_12, %c0_13] : memref<1x32xf32, #tpu.memory_space<vmem>>, vector<1x32xf32>
    %c0_14 = arith.constant 0 : index
    %c0_15 = arith.constant 0 : index
    %28 = vector.load %arg5[%c0_14, %c0_15] : memref<1x32xf32, #tpu.memory_space<vmem>>, vector<1x32xf32>
    %c0_16 = arith.constant 0 : index
    %c0_17 = arith.constant 0 : index
    %29 = vector.load %arg12[%c0_16, %c0_17] : memref<8x128xf32, #tpu.memory_space<vmem>>, vector<1x128xf32>
    %c7 = arith.constant 7 : index
    %c0_18 = arith.constant 0 : index
    %30 = vector.load %arg12[%c7, %c0_18] : memref<8x128xf32, #tpu.memory_space<vmem>>, vector<1x128xf32>
    %31 = arith.select %25, %29, %30 : vector<1x128xi1>, vector<1x128xf32>
    %cst_19 = arith.constant dense<0.000000e+00> : vector<1x128xf32>
    %32 = tpu.matmul %27, %26, %cst_19 {dimension_numbers = #tpu.dot_dimension_numbers<[1], [0], [0], [1], [0, 0, 1, 1], [], []>} : vector<1x32xf32>, vector<32x128xf32>, vector<1x128xf32> -> vector<1x128xf32>
    %33 = arith.addf %31, %32 : vector<1x128xf32>
    %34 = vector.extract_strided_slice %33 {offsets = [0, 0], sizes = [1, 96], strides = [1, 1]} : vector<1x128xf32> to vector<1x96xf32>
    %35 = arith.negf %34 : vector<1x96xf32>
    %36 = math.exp %35 : vector<1x96xf32>
    %cst_20 = arith.constant 1.000000e+00 : f32
    %37 = vector.broadcast %cst_20 : f32 to vector<1x96xf32>
    %38 = arith.addf %37, %36 : vector<1x96xf32>
    %39 = arith.divf %37, %38 : vector<1x96xf32>
    %40 = vector.extract_strided_slice %33 {offsets = [0, 96], sizes = [1, 32], strides = [1, 1]} : vector<1x128xf32> to vector<1x32xf32>
    %41 = math.tanh %40 : vector<1x32xf32>
    %42 = vector.extract_strided_slice %39 {offsets = [0, 0], sizes = [1, 32], strides = [1, 1]} : vector<1x96xf32> to vector<1x32xf32>
    %43 = vector.extract_strided_slice %39 {offsets = [0, 32], sizes = [1, 32], strides = [1, 1]} : vector<1x96xf32> to vector<1x32xf32>
    %44 = vector.extract_strided_slice %39 {offsets = [0, 64], sizes = [1, 32], strides = [1, 1]} : vector<1x96xf32> to vector<1x32xf32>
    %45 = arith.mulf %43, %28 : vector<1x32xf32>
    %46 = arith.mulf %42, %41 : vector<1x32xf32>
    %47 = arith.addf %45, %46 : vector<1x32xf32>
    %48 = math.tanh %47 : vector<1x32xf32>
    %49 = arith.mulf %44, %48 : vector<1x32xf32>
    %50 = vector.extract_strided_slice %49 {offsets = [0, 0], sizes = [1, 16], strides = [1, 1]} : vector<1x32xf32> to vector<1x16xf32>
    %c0_21 = arith.constant 0 : index
    %c0_22 = arith.constant 0 : index
    %51 = vector.load %arg13[%c0_21, %c0_22] : memref<8x32xf32, #tpu.memory_space<vmem>>, vector<1x16xf32>
    tpu.vector_store %arg13[%c0_21, %c0_22], %50 {strides = array<i32>} : memref<8x32xf32, #tpu.memory_space<vmem>>, vector<1x16xf32>,
    %52 = vector.extract_strided_slice %49 {offsets = [0, 16], sizes = [1, 16], strides = [1, 1]} : vector<1x32xf32> to vector<1x16xf32>
    %c7_23 = arith.constant 7 : index
    %c16 = arith.constant 16 : index
    %53 = vector.load %arg13[%c7_23, %c16] : memref<8x32xf32, #tpu.memory_space<vmem>>, vector<1x16xf32>
    tpu.vector_store %arg13[%c7_23, %c16], %52 {strides = array<i32>} : memref<8x32xf32, #tpu.memory_space<vmem>>, vector<1x16xf32>,
    %c1 = arith.constant 1 : index
    %c0_24 = arith.constant 0 : index
    %54 = vector.load %arg12[%c1, %c0_24] : memref<8x128xf32, #tpu.memory_space<vmem>>, vector<1x128xf32>
    %c6 = arith.constant 6 : index
    %c0_25 = arith.constant 0 : index
    %55 = vector.load %arg12[%c6, %c0_25] : memref<8x128xf32, #tpu.memory_space<vmem>>, vector<1x128xf32>
    %56 = arith.select %25, %54, %55 : vector<1x128xi1>, vector<1x128xf32>
    %cst_26 = arith.constant dense<0.000000e+00> : vector<1x128xf32>
    %57 = tpu.matmul %49, %26, %cst_26 {dimension_numbers = #tpu.dot_dimension_numbers<[1], [0], [0], [1], [0, 0, 1, 1], [], []>} : vector<1x32xf32>, vector<32x128xf32>, vector<1x128xf32> -> vector<1x128xf32>
    %58 = arith.addf %56, %57 : vector<1x128xf32>
    %59 = vector.extract_strided_slice %58 {offsets = [0, 0], sizes = [1, 96], strides = [1, 1]} : vector<1x128xf32> to vector<1x96xf32>
    %60 = arith.negf %59 : vector<1x96xf32>
    %61 = math.exp %60 : vector<1x96xf32>
    %cst_27 = arith.constant 1.000000e+00 : f32
    %62 = vector.broadcast %cst_27 : f32 to vector<1x96xf32>
    %63 = arith.addf %62, %61 : vector<1x96xf32>
    %64 = arith.divf %62, %63 : vector<1x96xf32>
    %65 = vector.extract_strided_slice %58 {offsets = [0, 96], sizes = [1, 32], strides = [1, 1]} : vector<1x128xf32> to vector<1x32xf32>
    %66 = math.tanh %65 : vector<1x32xf32>
    %67 = vector.extract_strided_slice %64 {offsets = [0, 0], sizes = [1, 32], strides = [1, 1]} : vector<1x96xf32> to vector<1x32xf32>
    %68 = vector.extract_strided_slice %64 {offsets = [0, 32], sizes = [1, 32], strides = [1, 1]} : vector<1x96xf32> to vector<1x32xf32>
    %69 = vector.extract_strided_slice %64 {offsets = [0, 64], sizes = [1, 32], strides = [1, 1]} : vector<1x96xf32> to vector<1x32xf32>
    %70 = arith.mulf %68, %47 : vector<1x32xf32>
    %71 = arith.mulf %67, %66 : vector<1x32xf32>
    %72 = arith.addf %70, %71 : vector<1x32xf32>
    %73 = math.tanh %72 : vector<1x32xf32>
    %74 = arith.mulf %69, %73 : vector<1x32xf32>
    %75 = vector.extract_strided_slice %74 {offsets = [0, 0], sizes = [1, 16], strides = [1, 1]} : vector<1x32xf32> to vector<1x16xf32>
    %c1_28 = arith.constant 1 : index
    %c0_29 = arith.constant 0 : index
    %76 = vector.load %arg13[%c1_28, %c0_29] : memref<8x32xf32, #tpu.memory_space<vmem>>, vector<1x16xf32>
    tpu.vector_store %arg13[%c1_28, %c0_29], %75 {strides = array<i32>} : memref<8x32xf32, #tpu.memory_space<vmem>>, vector<1x16xf32>,
    %77 = vector.extract_strided_slice %74 {offsets = [0, 16], sizes = [1, 16], strides = [1, 1]} : vector<1x32xf32> to vector<1x16xf32>
    %c6_30 = arith.constant 6 : index
    %c16_31 = arith.constant 16 : index
    %78 = vector.load %arg13[%c6_30, %c16_31] : memref<8x32xf32, #tpu.memory_space<vmem>>, vector<1x16xf32>
    tpu.vector_store %arg13[%c6_30, %c16_31], %77 {strides = array<i32>} : memref<8x32xf32, #tpu.memory_space<vmem>>, vector<1x16xf32>,
    %c2 = arith.constant 2 : index
    %c0_32 = arith.constant 0 : index
    %79 = vector.load %arg12[%c2, %c0_32] : memref<8x128xf32, #tpu.memory_space<vmem>>, vector<1x128xf32>
    %c5 = arith.constant 5 : index
    %c0_33 = arith.constant 0 : index
    %80 = vector.load %arg12[%c5, %c0_33] : memref<8x128xf32, #tpu.memory_space<vmem>>, vector<1x128xf32>
    %81 = arith.select %25, %79, %80 : vector<1x128xi1>, vector<1x128xf32>
    %cst_34 = arith.constant dense<0.000000e+00> : vector<1x128xf32>
    %82 = tpu.matmul %74, %26, %cst_34 {dimension_numbers = #tpu.dot_dimension_numbers<[1], [0], [0], [1], [0, 0, 1, 1], [], []>} : vector<1x32xf32>, vector<32x128xf32>, vector<1x128xf32> -> vector<1x128xf32>
    %83 = arith.addf %81, %82 : vector<1x128xf32>
    %84 = vector.extract_strided_slice %83 {offsets = [0, 0], sizes = [1, 96], strides = [1, 1]} : vector<1x128xf32> to vector<1x96xf32>
    %85 = arith.negf %84 : vector<1x96xf32>
    %86 = math.exp %85 : vector<1x96xf32>
    %cst_35 = arith.constant 1.000000e+00 : f32
    %87 = vector.broadcast %cst_35 : f32 to vector<1x96xf32>
    %88 = arith.addf %87, %86 : vector<1x96xf32>
    %89 = arith.divf %87, %88 : vector<1x96xf32>
    %90 = vector.extract_strided_slice %83 {offsets = [0, 96], sizes = [1, 32], strides = [1, 1]} : vector<1x128xf32> to vector<1x32xf32>
    %91 = math.tanh %90 : vector<1x32xf32>
    %92 = vector.extract_strided_slice %89 {offsets = [0, 0], sizes = [1, 32], strides = [1, 1]} : vector<1x96xf32> to vector<1x32xf32>
    %93 = vector.extract_strided_slice %89 {offsets = [0, 32], sizes = [1, 32], strides = [1, 1]} : vector<1x96xf32> to vector<1x32xf32>
    %94 = vector.extract_strided_slice %89 {offsets = [0, 64], sizes = [1, 32], strides = [1, 1]} : vector<1x96xf32> to vector<1x32xf32>
    %95 = arith.mulf %93, %72 : vector<1x32xf32>
    %96 = arith.mulf %92, %91 : vector<1x32xf32>
    %97 = arith.addf %95, %96 : vector<1x32xf32>
    %98 = math.tanh %97 : vector<1x32xf32>
    %99 = arith.mulf %94, %98 : vector<1x32xf32>
    %100 = vector.extract_strided_slice %99 {offsets = [0, 0], sizes = [1, 16], strides = [1, 1]} : vector<1x32xf32> to vector<1x16xf32>
    %c2_36 = arith.constant 2 : index
    %c0_37 = arith.constant 0 : index
    %101 = vector.load %arg13[%c2_36, %c0_37] : memref<8x32xf32, #tpu.memory_space<vmem>>, vector<1x16xf32>
    tpu.vector_store %arg13[%c2_36, %c0_37], %100 {strides = array<i32>} : memref<8x32xf32, #tpu.memory_space<vmem>>, vector<1x16xf32>,
    %102 = vector.extract_strided_slice %99 {offsets = [0, 16], sizes = [1, 16], strides = [1, 1]} : vector<1x32xf32> to vector<1x16xf32>
    %c5_38 = arith.constant 5 : index
    %c16_39 = arith.constant 16 : index
    %103 = vector.load %arg13[%c5_38, %c16_39] : memref<8x32xf32, #tpu.memory_space<vmem>>, vector<1x16xf32>
    tpu.vector_store %arg13[%c5_38, %c16_39], %102 {strides = array<i32>} : memref<8x32xf32, #tpu.memory_space<vmem>>, vector<1x16xf32>,
    %c3 = arith.constant 3 : index
    %c0_40 = arith.constant 0 : index
    %104 = vector.load %arg12[%c3, %c0_40] : memref<8x128xf32, #tpu.memory_space<vmem>>, vector<1x128xf32>
    %c4 = arith.constant 4 : index
    %c0_41 = arith.constant 0 : index
    %105 = vector.load %arg12[%c4, %c0_41] : memref<8x128xf32, #tpu.memory_space<vmem>>, vector<1x128xf32>
    %106 = arith.select %25, %104, %105 : vector<1x128xi1>, vector<1x128xf32>
    %cst_42 = arith.constant dense<0.000000e+00> : vector<1x128xf32>
    %107 = tpu.matmul %99, %26, %cst_42 {dimension_numbers = #tpu.dot_dimension_numbers<[1], [0], [0], [1], [0, 0, 1, 1], [], []>} : vector<1x32xf32>, vector<32x128xf32>, vector<1x128xf32> -> vector<1x128xf32>
    %108 = arith.addf %106, %107 : vector<1x128xf32>
    %109 = vector.extract_strided_slice %108 {offsets = [0, 0], sizes = [1, 96], strides = [1, 1]} : vector<1x128xf32> to vector<1x96xf32>
    %110 = arith.negf %109 : vector<1x96xf32>
    %111 = math.exp %110 : vector<1x96xf32>
    %cst_43 = arith.constant 1.000000e+00 : f32
    %112 = vector.broadcast %cst_43 : f32 to vector<1x96xf32>
    %113 = arith.addf %112, %111 : vector<1x96xf32>
    %114 = arith.divf %112, %113 : vector<1x96xf32>
    %115 = vector.extract_strided_slice %108 {offsets = [0, 96], sizes = [1, 32], strides = [1, 1]} : vector<1x128xf32> to vector<1x32xf32>
    %116 = math.tanh %115 : vector<1x32xf32>
    %117 = vector.extract_strided_slice %114 {offsets = [0, 0], sizes = [1, 32], strides = [1, 1]} : vector<1x96xf32> to vector<1x32xf32>
    %118 = vector.extract_strided_slice %114 {offsets = [0, 32], sizes = [1, 32], strides = [1, 1]} : vector<1x96xf32> to vector<1x32xf32>
    %119 = vector.extract_strided_slice %114 {offsets = [0, 64], sizes = [1, 32], strides = [1, 1]} : vector<1x96xf32> to vector<1x32xf32>
    %120 = arith.mulf %118, %97 : vector<1x32xf32>
    %121 = arith.mulf %117, %116 : vector<1x32xf32>
    %122 = arith.addf %120, %121 : vector<1x32xf32>
    %123 = math.tanh %122 : vector<1x32xf32>
    %124 = arith.mulf %119, %123 : vector<1x32xf32>
    %125 = vector.extract_strided_slice %124 {offsets = [0, 0], sizes = [1, 16], strides = [1, 1]} : vector<1x32xf32> to vector<1x16xf32>
    %c3_44 = arith.constant 3 : index
    %c0_45 = arith.constant 0 : index
    %126 = vector.load %arg13[%c3_44, %c0_45] : memref<8x32xf32, #tpu.memory_space<vmem>>, vector<1x16xf32>
    tpu.vector_store %arg13[%c3_44, %c0_45], %125 {strides = array<i32>} : memref<8x32xf32, #tpu.memory_space<vmem>>, vector<1x16xf32>,
    %127 = vector.extract_strided_slice %124 {offsets = [0, 16], sizes = [1, 16], strides = [1, 1]} : vector<1x32xf32> to vector<1x16xf32>
    %c4_46 = arith.constant 4 : index
    %c16_47 = arith.constant 16 : index
    %128 = vector.load %arg13[%c4_46, %c16_47] : memref<8x32xf32, #tpu.memory_space<vmem>>, vector<1x16xf32>
    tpu.vector_store %arg13[%c4_46, %c16_47], %127 {strides = array<i32>} : memref<8x32xf32, #tpu.memory_space<vmem>>, vector<1x16xf32>,
    %c4_48 = arith.constant 4 : index
    %c0_49 = arith.constant 0 : index
    %129 = vector.load %arg12[%c4_48, %c0_49] : memref<8x128xf32, #tpu.memory_space<vmem>>, vector<1x128xf32>
    %c3_50 = arith.constant 3 : index
    %c0_51 = arith.constant 0 : index
    %130 = vector.load %arg12[%c3_50, %c0_51] : memref<8x128xf32, #tpu.memory_space<vmem>>, vector<1x128xf32>
    %131 = arith.select %25, %129, %130 : vector<1x128xi1>, vector<1x128xf32>
    %cst_52 = arith.constant dense<0.000000e+00> : vector<1x128xf32>
    %132 = tpu.matmul %124, %26, %cst_52 {dimension_numbers = #tpu.dot_dimension_numbers<[1], [0], [0], [1], [0, 0, 1, 1], [], []>} : vector<1x32xf32>, vector<32x128xf32>, vector<1x128xf32> -> vector<1x128xf32>
    %133 = arith.addf %131, %132 : vector<1x128xf32>
    %134 = vector.extract_strided_slice %133 {offsets = [0, 0], sizes = [1, 96], strides = [1, 1]} : vector<1x128xf32> to vector<1x96xf32>
    %135 = arith.negf %134 : vector<1x96xf32>
    %136 = math.exp %135 : vector<1x96xf32>
    %cst_53 = arith.constant 1.000000e+00 : f32
    %137 = vector.broadcast %cst_53 : f32 to vector<1x96xf32>
    %138 = arith.addf %137, %136 : vector<1x96xf32>
    %139 = arith.divf %137, %138 : vector<1x96xf32>
    %140 = vector.extract_strided_slice %133 {offsets = [0, 96], sizes = [1, 32], strides = [1, 1]} : vector<1x128xf32> to vector<1x32xf32>
    %141 = math.tanh %140 : vector<1x32xf32>
    %142 = vector.extract_strided_slice %139 {offsets = [0, 0], sizes = [1, 32], strides = [1, 1]} : vector<1x96xf32> to vector<1x32xf32>
    %143 = vector.extract_strided_slice %139 {offsets = [0, 32], sizes = [1, 32], strides = [1, 1]} : vector<1x96xf32> to vector<1x32xf32>
    %144 = vector.extract_strided_slice %139 {offsets = [0, 64], sizes = [1, 32], strides = [1, 1]} : vector<1x96xf32> to vector<1x32xf32>
    %145 = arith.mulf %143, %122 : vector<1x32xf32>
    %146 = arith.mulf %142, %141 : vector<1x32xf32>
    %147 = arith.addf %145, %146 : vector<1x32xf32>
    %148 = math.tanh %147 : vector<1x32xf32>
    %149 = arith.mulf %144, %148 : vector<1x32xf32>
    %150 = vector.extract_strided_slice %149 {offsets = [0, 0], sizes = [1, 16], strides = [1, 1]} : vector<1x32xf32> to vector<1x16xf32>
    %c4_54 = arith.constant 4 : index
    %c0_55 = arith.constant 0 : index
    %151 = vector.load %arg13[%c4_54, %c0_55] : memref<8x32xf32, #tpu.memory_space<vmem>>, vector<1x16xf32>
    tpu.vector_store %arg13[%c4_54, %c0_55], %150 {strides = array<i32>} : memref<8x32xf32, #tpu.memory_space<vmem>>, vector<1x16xf32>,
    %152 = vector.extract_strided_slice %149 {offsets = [0, 16], sizes = [1, 16], strides = [1, 1]} : vector<1x32xf32> to vector<1x16xf32>
    %c3_56 = arith.constant 3 : index
    %c16_57 = arith.constant 16 : index
    %153 = vector.load %arg13[%c3_56, %c16_57] : memref<8x32xf32, #tpu.memory_space<vmem>>, vector<1x16xf32>
    tpu.vector_store %arg13[%c3_56, %c16_57], %152 {strides = array<i32>} : memref<8x32xf32, #tpu.memory_space<vmem>>, vector<1x16xf32>,
    %c5_58 = arith.constant 5 : index
    %c0_59 = arith.constant 0 : index
    %154 = vector.load %arg12[%c5_58, %c0_59] : memref<8x128xf32, #tpu.memory_space<vmem>>, vector<1x128xf32>
    %c2_60 = arith.constant 2 : index
    %c0_61 = arith.constant 0 : index
    %155 = vector.load %arg12[%c2_60, %c0_61] : memref<8x128xf32, #tpu.memory_space<vmem>>, vector<1x128xf32>
    %156 = arith.select %25, %154, %155 : vector<1x128xi1>, vector<1x128xf32>
    %cst_62 = arith.constant dense<0.000000e+00> : vector<1x128xf32>
    %157 = tpu.matmul %149, %26, %cst_62 {dimension_numbers = #tpu.dot_dimension_numbers<[1], [0], [0], [1], [0, 0, 1, 1], [], []>} : vector<1x32xf32>, vector<32x128xf32>, vector<1x128xf32> -> vector<1x128xf32>
    %158 = arith.addf %156, %157 : vector<1x128xf32>
    %159 = vector.extract_strided_slice %158 {offsets = [0, 0], sizes = [1, 96], strides = [1, 1]} : vector<1x128xf32> to vector<1x96xf32>
    %160 = arith.negf %159 : vector<1x96xf32>
    %161 = math.exp %160 : vector<1x96xf32>
    %cst_63 = arith.constant 1.000000e+00 : f32
    %162 = vector.broadcast %cst_63 : f32 to vector<1x96xf32>
    %163 = arith.addf %162, %161 : vector<1x96xf32>
    %164 = arith.divf %162, %163 : vector<1x96xf32>
    %165 = vector.extract_strided_slice %158 {offsets = [0, 96], sizes = [1, 32], strides = [1, 1]} : vector<1x128xf32> to vector<1x32xf32>
    %166 = math.tanh %165 : vector<1x32xf32>
    %167 = vector.extract_strided_slice %164 {offsets = [0, 0], sizes = [1, 32], strides = [1, 1]} : vector<1x96xf32> to vector<1x32xf32>
    %168 = vector.extract_strided_slice %164 {offsets = [0, 32], sizes = [1, 32], strides = [1, 1]} : vector<1x96xf32> to vector<1x32xf32>
    %169 = vector.extract_strided_slice %164 {offsets = [0, 64], sizes = [1, 32], strides = [1, 1]} : vector<1x96xf32> to vector<1x32xf32>
    %170 = arith.mulf %168, %147 : vector<1x32xf32>
    %171 = arith.mulf %167, %166 : vector<1x32xf32>
    %172 = arith.addf %170, %171 : vector<1x32xf32>
    %173 = math.tanh %172 : vector<1x32xf32>
    %174 = arith.mulf %169, %173 : vector<1x32xf32>
    %175 = vector.extract_strided_slice %174 {offsets = [0, 0], sizes = [1, 16], strides = [1, 1]} : vector<1x32xf32> to vector<1x16xf32>
    %c5_64 = arith.constant 5 : index
    %c0_65 = arith.constant 0 : index
    %176 = vector.load %arg13[%c5_64, %c0_65] : memref<8x32xf32, #tpu.memory_space<vmem>>, vector<1x16xf32>
    tpu.vector_store %arg13[%c5_64, %c0_65], %175 {strides = array<i32>} : memref<8x32xf32, #tpu.memory_space<vmem>>, vector<1x16xf32>,
    %177 = vector.extract_strided_slice %174 {offsets = [0, 16], sizes = [1, 16], strides = [1, 1]} : vector<1x32xf32> to vector<1x16xf32>
    %c2_66 = arith.constant 2 : index
    %c16_67 = arith.constant 16 : index
    %178 = vector.load %arg13[%c2_66, %c16_67] : memref<8x32xf32, #tpu.memory_space<vmem>>, vector<1x16xf32>
    tpu.vector_store %arg13[%c2_66, %c16_67], %177 {strides = array<i32>} : memref<8x32xf32, #tpu.memory_space<vmem>>, vector<1x16xf32>,
    %c6_68 = arith.constant 6 : index
    %c0_69 = arith.constant 0 : index
    %179 = vector.load %arg12[%c6_68, %c0_69] : memref<8x128xf32, #tpu.memory_space<vmem>>, vector<1x128xf32>
    %c1_70 = arith.constant 1 : index
    %c0_71 = arith.constant 0 : index
    %180 = vector.load %arg12[%c1_70, %c0_71] : memref<8x128xf32, #tpu.memory_space<vmem>>, vector<1x128xf32>
    %181 = arith.select %25, %179, %180 : vector<1x128xi1>, vector<1x128xf32>
    %cst_72 = arith.constant dense<0.000000e+00> : vector<1x128xf32>
    %182 = tpu.matmul %174, %26, %cst_72 {dimension_numbers = #tpu.dot_dimension_numbers<[1], [0], [0], [1], [0, 0, 1, 1], [], []>} : vector<1x32xf32>, vector<32x128xf32>, vector<1x128xf32> -> vector<1x128xf32>
    %183 = arith.addf %181, %182 : vector<1x128xf32>
    %184 = vector.extract_strided_slice %183 {offsets = [0, 0], sizes = [1, 96], strides = [1, 1]} : vector<1x128xf32> to vector<1x96xf32>
    %185 = arith.negf %184 : vector<1x96xf32>
    %186 = math.exp %185 : vector<1x96xf32>
    %cst_73 = arith.constant 1.000000e+00 : f32
    %187 = vector.broadcast %cst_73 : f32 to vector<1x96xf32>
    %188 = arith.addf %187, %186 : vector<1x96xf32>
    %189 = arith.divf %187, %188 : vector<1x96xf32>
    %190 = vector.extract_strided_slice %183 {offsets = [0, 96], sizes = [1, 32], strides = [1, 1]} : vector<1x128xf32> to vector<1x32xf32>
    %191 = math.tanh %190 : vector<1x32xf32>
    %192 = vector.extract_strided_slice %189 {offsets = [0, 0], sizes = [1, 32], strides = [1, 1]} : vector<1x96xf32> to vector<1x32xf32>
    %193 = vector.extract_strided_slice %189 {offsets = [0, 32], sizes = [1, 32], strides = [1, 1]} : vector<1x96xf32> to vector<1x32xf32>
    %194 = vector.extract_strided_slice %189 {offsets = [0, 64], sizes = [1, 32], strides = [1, 1]} : vector<1x96xf32> to vector<1x32xf32>
    %195 = arith.mulf %193, %172 : vector<1x32xf32>
    %196 = arith.mulf %192, %191 : vector<1x32xf32>
    %197 = arith.addf %195, %196 : vector<1x32xf32>
    %198 = math.tanh %197 : vector<1x32xf32>
    %199 = arith.mulf %194, %198 : vector<1x32xf32>
    %200 = vector.extract_strided_slice %199 {offsets = [0, 0], sizes = [1, 16], strides = [1, 1]} : vector<1x32xf32> to vector<1x16xf32>
    %c6_74 = arith.constant 6 : index
    %c0_75 = arith.constant 0 : index
    %201 = vector.load %arg13[%c6_74, %c0_75] : memref<8x32xf32, #tpu.memory_space<vmem>>, vector<1x16xf32>
    tpu.vector_store %arg13[%c6_74, %c0_75], %200 {strides = array<i32>} : memref<8x32xf32, #tpu.memory_space<vmem>>, vector<1x16xf32>,
    %202 = vector.extract_strided_slice %199 {offsets = [0, 16], sizes = [1, 16], strides = [1, 1]} : vector<1x32xf32> to vector<1x16xf32>
    %c1_76 = arith.constant 1 : index
    %c16_77 = arith.constant 16 : index
    %203 = vector.load %arg13[%c1_76, %c16_77] : memref<8x32xf32, #tpu.memory_space<vmem>>, vector<1x16xf32>
    tpu.vector_store %arg13[%c1_76, %c16_77], %202 {strides = array<i32>} : memref<8x32xf32, #tpu.memory_space<vmem>>, vector<1x16xf32>,
    %c7_78 = arith.constant 7 : index
    %c0_79 = arith.constant 0 : index
    %204 = vector.load %arg12[%c7_78, %c0_79] : memref<8x128xf32, #tpu.memory_space<vmem>>, vector<1x128xf32>
    %c0_80 = arith.constant 0 : index
    %c0_81 = arith.constant 0 : index
    %205 = vector.load %arg12[%c0_80, %c0_81] : memref<8x128xf32, #tpu.memory_space<vmem>>, vector<1x128xf32>
    %206 = arith.select %25, %204, %205 : vector<1x128xi1>, vector<1x128xf32>
    %cst_82 = arith.constant dense<0.000000e+00> : vector<1x128xf32>
    %207 = tpu.matmul %199, %26, %cst_82 {dimension_numbers = #tpu.dot_dimension_numbers<[1], [0], [0], [1], [0, 0, 1, 1], [], []>} : vector<1x32xf32>, vector<32x128xf32>, vector<1x128xf32> -> vector<1x128xf32>
    %208 = arith.addf %206, %207 : vector<1x128xf32>
    %209 = vector.extract_strided_slice %208 {offsets = [0, 0], sizes = [1, 96], strides = [1, 1]} : vector<1x128xf32> to vector<1x96xf32>
    %210 = arith.negf %209 : vector<1x96xf32>
    %211 = math.exp %210 : vector<1x96xf32>
    %cst_83 = arith.constant 1.000000e+00 : f32
    %212 = vector.broadcast %cst_83 : f32 to vector<1x96xf32>
    %213 = arith.addf %212, %211 : vector<1x96xf32>
    %214 = arith.divf %212, %213 : vector<1x96xf32>
    %215 = vector.extract_strided_slice %208 {offsets = [0, 96], sizes = [1, 32], strides = [1, 1]} : vector<1x128xf32> to vector<1x32xf32>
    %216 = math.tanh %215 : vector<1x32xf32>
    %217 = vector.extract_strided_slice %214 {offsets = [0, 0], sizes = [1, 32], strides = [1, 1]} : vector<1x96xf32> to vector<1x32xf32>
    %218 = vector.extract_strided_slice %214 {offsets = [0, 32], sizes = [1, 32], strides = [1, 1]} : vector<1x96xf32> to vector<1x32xf32>
    %219 = vector.extract_strided_slice %214 {offsets = [0, 64], sizes = [1, 32], strides = [1, 1]} : vector<1x96xf32> to vector<1x32xf32>
    %220 = arith.mulf %218, %197 : vector<1x32xf32>
    %221 = arith.mulf %217, %216 : vector<1x32xf32>
    %222 = arith.addf %220, %221 : vector<1x32xf32>
    %223 = math.tanh %222 : vector<1x32xf32>
    %224 = arith.mulf %219, %223 : vector<1x32xf32>
    %225 = vector.extract_strided_slice %224 {offsets = [0, 0], sizes = [1, 16], strides = [1, 1]} : vector<1x32xf32> to vector<1x16xf32>
    %c7_84 = arith.constant 7 : index
    %c0_85 = arith.constant 0 : index
    %226 = vector.load %arg13[%c7_84, %c0_85] : memref<8x32xf32, #tpu.memory_space<vmem>>, vector<1x16xf32>
    tpu.vector_store %arg13[%c7_84, %c0_85], %225 {strides = array<i32>} : memref<8x32xf32, #tpu.memory_space<vmem>>, vector<1x16xf32>,
    %227 = vector.extract_strided_slice %224 {offsets = [0, 16], sizes = [1, 16], strides = [1, 1]} : vector<1x32xf32> to vector<1x16xf32>
    %c0_86 = arith.constant 0 : index
    %c16_87 = arith.constant 16 : index
    %228 = vector.load %arg13[%c0_86, %c16_87] : memref<8x32xf32, #tpu.memory_space<vmem>>, vector<1x16xf32>
    tpu.vector_store %arg13[%c0_86, %c16_87], %227 {strides = array<i32>} : memref<8x32xf32, #tpu.memory_space<vmem>>, vector<1x16xf32>,
    %c0_88 = arith.constant 0 : index
    %c0_89 = arith.constant 0 : index
    %229 = vector.load %arg13[%c0_88, %c0_89] : memref<8x32xf32, #tpu.memory_space<vmem>>, vector<8x32xf32>
    %c0_90 = arith.constant 0 : index
    %c0_91 = arith.constant 0 : index
    %230 = vector.load %arg6[%c0_90, %c0_91] : memref<32x23xf32, #tpu.memory_space<vmem>>, vector<32x23xf32>
    %cst_92 = arith.constant dense<0.000000e+00> : vector<8x23xf32>
    %231 = tpu.matmul %229, %230, %cst_92 {dimension_numbers = #tpu.dot_dimension_numbers<[1], [0], [0], [1], [0, 0, 1, 1], [], []>} : vector<8x32xf32>, vector<32x23xf32>, vector<8x23xf32> -> vector<8x23xf32>
    %c0_93 = arith.constant 0 : index
    %c0_94 = arith.constant 0 : index
    %232 = vector.load %arg7[%c0_93, %c0_94] : memref<1x23xf32, #tpu.memory_space<vmem>>, vector<1x23xf32>
    %233 = vector.broadcast %232 : vector<1x23xf32> to vector<8x23xf32>
    %234 = arith.addf %231, %233 : vector<8x23xf32>
    %c0_95 = arith.constant 0 : index
    %c0_96 = arith.constant 0 : index
    %235 = vector.load %arg8[%c0_95, %c0_96] : memref<23x23xf32, #tpu.memory_space<vmem>>, vector<23x23xf32>
    %236 = tpu.iota {dimensions = array<i32: 1>} : vector<1x23xi32>
    %c21_i32 = arith.constant 21 : i32
    %237 = vector.broadcast %c21_i32 : i32 to vector<1x23xi32>
    %238 = arith.cmpi eq, %236, %237 : vector<1x23xi32>
    %cst_97 = arith.constant 0.000000e+00 : f32
    %cst_98 = arith.constant -1.000000e+04 : f32
    %239 = vector.broadcast %cst_97 : f32 to vector<1x23xf32>
    %240 = vector.broadcast %cst_98 : f32 to vector<1x23xf32>
    %241 = arith.select %238, %239, %240 : vector<1x23xi1>, vector<1x23xf32>
    %242 = tpu.iota {dimensions = array<i32: 1>} : vector<23x23xi32>
    %243 = vector.broadcast %241 : vector<1x23xf32> to vector<23x23xf32>
    %244 = arith.addf %235, %243 : vector<23x23xf32>
    %cst_99 = arith.constant dense<0xFF800000> : vector<23xf32>
    %245 = vector.multi_reduction <maximumf>, %244, %cst_99 [1] : vector<23x23xf32> to vector<23xf32>
    %246 = vector.shape_cast %245 : vector<23xf32> to vector<23x1xf32>
    %247 = vector.broadcast %246 : vector<23x1xf32> to vector<23x23xf32>
    %248 = arith.cmpf oeq, %244, %247 : vector<23x23xf32>
    %c23_i32 = arith.constant 23 : i32
    %249 = vector.broadcast %c23_i32 : i32 to vector<23x23xi32>
    %250 = arith.select %248, %242, %249 : vector<23x23xi1>, vector<23x23xi32>
    %cst_100 = arith.constant dense<2147483647> : vector<23xi32>
    %251 = vector.multi_reduction <minsi>, %250, %cst_100 [1] : vector<23x23xi32> to vector<23xi32>
    %252 = vector.shape_cast %251 : vector<23xi32> to vector<1x23xi32>
    %c0_101 = arith.constant 0 : index
    %c0_102 = arith.constant 0 : index
    %253 = vector.load %arg10[%c0_101, %c0_102] : memref<8x23xi32, #tpu.memory_space<vmem>>, vector<1x23xi32>
    tpu.vector_store %arg10[%c0_101, %c0_102], %252 {strides = array<i32>} : memref<8x23xi32, #tpu.memory_space<vmem>>, vector<1x23xi32>,
    %254 = vector.shape_cast %245 : vector<23xf32> to vector<1x23xf32>
    %255 = vector.extract_strided_slice %234 {offsets = [0, 0], sizes = [1, 23], strides = [1, 1]} : vector<8x23xf32> to vector<1x23xf32>
    %256 = arith.addf %254, %255 : vector<1x23xf32>
    %257 = vector.broadcast %256 : vector<1x23xf32> to vector<23x23xf32>
    %258 = arith.addf %235, %257 : vector<23x23xf32>
    %cst_103 = arith.constant dense<0xFF800000> : vector<23xf32>
    %259 = vector.multi_reduction <maximumf>, %258, %cst_103 [1] : vector<23x23xf32> to vector<23xf32>
    %260 = vector.shape_cast %259 : vector<23xf32> to vector<23x1xf32>
    %261 = vector.broadcast %260 : vector<23x1xf32> to vector<23x23xf32>
    %262 = arith.cmpf oeq, %258, %261 : vector<23x23xf32>
    %c23_i32_104 = arith.constant 23 : i32
    %263 = vector.broadcast %c23_i32_104 : i32 to vector<23x23xi32>
    %264 = arith.select %262, %242, %263 : vector<23x23xi1>, vector<23x23xi32>
    %cst_105 = arith.constant dense<2147483647> : vector<23xi32>
    %265 = vector.multi_reduction <minsi>, %264, %cst_105 [1] : vector<23x23xi32> to vector<23xi32>
    %266 = vector.shape_cast %265 : vector<23xi32> to vector<1x23xi32>
    %c1_106 = arith.constant 1 : index
    %c0_107 = arith.constant 0 : index
    %267 = vector.load %arg10[%c1_106, %c0_107] : memref<8x23xi32, #tpu.memory_space<vmem>>, vector<1x23xi32>
    tpu.vector_store %arg10[%c1_106, %c0_107], %266 {strides = array<i32>} : memref<8x23xi32, #tpu.memory_space<vmem>>, vector<1x23xi32>,
    %268 = vector.shape_cast %259 : vector<23xf32> to vector<1x23xf32>
    %269 = vector.extract_strided_slice %234 {offsets = [1, 0], sizes = [1, 23], strides = [1, 1]} : vector<8x23xf32> to vector<1x23xf32>
    %270 = arith.addf %268, %269 : vector<1x23xf32>
    %271 = vector.broadcast %270 : vector<1x23xf32> to vector<23x23xf32>
    %272 = arith.addf %235, %271 : vector<23x23xf32>
    %cst_108 = arith.constant dense<0xFF800000> : vector<23xf32>
    %273 = vector.multi_reduction <maximumf>, %272, %cst_108 [1] : vector<23x23xf32> to vector<23xf32>
    %274 = vector.shape_cast %273 : vector<23xf32> to vector<23x1xf32>
    %275 = vector.broadcast %274 : vector<23x1xf32> to vector<23x23xf32>
    %276 = arith.cmpf oeq, %272, %275 : vector<23x23xf32>
    %c23_i32_109 = arith.constant 23 : i32
    %277 = vector.broadcast %c23_i32_109 : i32 to vector<23x23xi32>
    %278 = arith.select %276, %242, %277 : vector<23x23xi1>, vector<23x23xi32>
    %cst_110 = arith.constant dense<2147483647> : vector<23xi32>
    %279 = vector.multi_reduction <minsi>, %278, %cst_110 [1] : vector<23x23xi32> to vector<23xi32>
    %280 = vector.shape_cast %279 : vector<23xi32> to vector<1x23xi32>
    %c2_111 = arith.constant 2 : index
    %c0_112 = arith.constant 0 : index
    %281 = vector.load %arg10[%c2_111, %c0_112] : memref<8x23xi32, #tpu.memory_space<vmem>>, vector<1x23xi32>
    tpu.vector_store %arg10[%c2_111, %c0_112], %280 {strides = array<i32>} : memref<8x23xi32, #tpu.memory_space<vmem>>, vector<1x23xi32>,
    %282 = vector.shape_cast %273 : vector<23xf32> to vector<1x23xf32>
    %283 = vector.extract_strided_slice %234 {offsets = [2, 0], sizes = [1, 23], strides = [1, 1]} : vector<8x23xf32> to vector<1x23xf32>
    %284 = arith.addf %282, %283 : vector<1x23xf32>
    %285 = vector.broadcast %284 : vector<1x23xf32> to vector<23x23xf32>
    %286 = arith.addf %235, %285 : vector<23x23xf32>
    %cst_113 = arith.constant dense<0xFF800000> : vector<23xf32>
    %287 = vector.multi_reduction <maximumf>, %286, %cst_113 [1] : vector<23x23xf32> to vector<23xf32>
    %288 = vector.shape_cast %287 : vector<23xf32> to vector<23x1xf32>
    %289 = vector.broadcast %288 : vector<23x1xf32> to vector<23x23xf32>
    %290 = arith.cmpf oeq, %286, %289 : vector<23x23xf32>
    %c23_i32_114 = arith.constant 23 : i32
    %291 = vector.broadcast %c23_i32_114 : i32 to vector<23x23xi32>
    %292 = arith.select %290, %242, %291 : vector<23x23xi1>, vector<23x23xi32>
    %cst_115 = arith.constant dense<2147483647> : vector<23xi32>
    %293 = vector.multi_reduction <minsi>, %292, %cst_115 [1] : vector<23x23xi32> to vector<23xi32>
    %294 = vector.shape_cast %293 : vector<23xi32> to vector<1x23xi32>
    %c3_116 = arith.constant 3 : index
    %c0_117 = arith.constant 0 : index
    %295 = vector.load %arg10[%c3_116, %c0_117] : memref<8x23xi32, #tpu.memory_space<vmem>>, vector<1x23xi32>
    tpu.vector_store %arg10[%c3_116, %c0_117], %294 {strides = array<i32>} : memref<8x23xi32, #tpu.memory_space<vmem>>, vector<1x23xi32>,
    %296 = vector.shape_cast %287 : vector<23xf32> to vector<1x23xf32>
    %297 = vector.extract_strided_slice %234 {offsets = [3, 0], sizes = [1, 23], strides = [1, 1]} : vector<8x23xf32> to vector<1x23xf32>
    %298 = arith.addf %296, %297 : vector<1x23xf32>
    %299 = vector.broadcast %298 : vector<1x23xf32> to vector<23x23xf32>
    %300 = arith.addf %235, %299 : vector<23x23xf32>
    %cst_118 = arith.constant dense<0xFF800000> : vector<23xf32>
    %301 = vector.multi_reduction <maximumf>, %300, %cst_118 [1] : vector<23x23xf32> to vector<23xf32>
    %302 = vector.shape_cast %301 : vector<23xf32> to vector<23x1xf32>
    %303 = vector.broadcast %302 : vector<23x1xf32> to vector<23x23xf32>
    %304 = arith.cmpf oeq, %300, %303 : vector<23x23xf32>
    %c23_i32_119 = arith.constant 23 : i32
    %305 = vector.broadcast %c23_i32_119 : i32 to vector<23x23xi32>
    %306 = arith.select %304, %242, %305 : vector<23x23xi1>, vector<23x23xi32>
    %cst_120 = arith.constant dense<2147483647> : vector<23xi32>
    %307 = vector.multi_reduction <minsi>, %306, %cst_120 [1] : vector<23x23xi32> to vector<23xi32>
    %308 = vector.shape_cast %307 : vector<23xi32> to vector<1x23xi32>
    %c4_121 = arith.constant 4 : index
    %c0_122 = arith.constant 0 : index
    %309 = vector.load %arg10[%c4_121, %c0_122] : memref<8x23xi32, #tpu.memory_space<vmem>>, vector<1x23xi32>
    tpu.vector_store %arg10[%c4_121, %c0_122], %308 {strides = array<i32>} : memref<8x23xi32, #tpu.memory_space<vmem>>, vector<1x23xi32>,
    %310 = vector.shape_cast %301 : vector<23xf32> to vector<1x23xf32>
    %311 = vector.extract_strided_slice %234 {offsets = [4, 0], sizes = [1, 23], strides = [1, 1]} : vector<8x23xf32> to vector<1x23xf32>
    %312 = arith.addf %310, %311 : vector<1x23xf32>
    %313 = vector.broadcast %312 : vector<1x23xf32> to vector<23x23xf32>
    %314 = arith.addf %235, %313 : vector<23x23xf32>
    %cst_123 = arith.constant dense<0xFF800000> : vector<23xf32>
    %315 = vector.multi_reduction <maximumf>, %314, %cst_123 [1] : vector<23x23xf32> to vector<23xf32>
    %316 = vector.shape_cast %315 : vector<23xf32> to vector<23x1xf32>
    %317 = vector.broadcast %316 : vector<23x1xf32> to vector<23x23xf32>
    %318 = arith.cmpf oeq, %314, %317 : vector<23x23xf32>
    %c23_i32_124 = arith.constant 23 : i32
    %319 = vector.broadcast %c23_i32_124 : i32 to vector<23x23xi32>
    %320 = arith.select %318, %242, %319 : vector<23x23xi1>, vector<23x23xi32>
    %cst_125 = arith.constant dense<2147483647> : vector<23xi32>
    %321 = vector.multi_reduction <minsi>, %320, %cst_125 [1] : vector<23x23xi32> to vector<23xi32>
    %322 = vector.shape_cast %321 : vector<23xi32> to vector<1x23xi32>
    %c5_126 = arith.constant 5 : index
    %c0_127 = arith.constant 0 : index
    %323 = vector.load %arg10[%c5_126, %c0_127] : memref<8x23xi32, #tpu.memory_space<vmem>>, vector<1x23xi32>
    tpu.vector_store %arg10[%c5_126, %c0_127], %322 {strides = array<i32>} : memref<8x23xi32, #tpu.memory_space<vmem>>, vector<1x23xi32>,
    %324 = vector.shape_cast %315 : vector<23xf32> to vector<1x23xf32>
    %325 = vector.extract_strided_slice %234 {offsets = [5, 0], sizes = [1, 23], strides = [1, 1]} : vector<8x23xf32> to vector<1x23xf32>
    %326 = arith.addf %324, %325 : vector<1x23xf32>
    %327 = vector.broadcast %326 : vector<1x23xf32> to vector<23x23xf32>
    %328 = arith.addf %235, %327 : vector<23x23xf32>
    %cst_128 = arith.constant dense<0xFF800000> : vector<23xf32>
    %329 = vector.multi_reduction <maximumf>, %328, %cst_128 [1] : vector<23x23xf32> to vector<23xf32>
    %330 = vector.shape_cast %329 : vector<23xf32> to vector<23x1xf32>
    %331 = vector.broadcast %330 : vector<23x1xf32> to vector<23x23xf32>
    %332 = arith.cmpf oeq, %328, %331 : vector<23x23xf32>
    %c23_i32_129 = arith.constant 23 : i32
    %333 = vector.broadcast %c23_i32_129 : i32 to vector<23x23xi32>
    %334 = arith.select %332, %242, %333 : vector<23x23xi1>, vector<23x23xi32>
    %cst_130 = arith.constant dense<2147483647> : vector<23xi32>
    %335 = vector.multi_reduction <minsi>, %334, %cst_130 [1] : vector<23x23xi32> to vector<23xi32>
    %336 = vector.shape_cast %335 : vector<23xi32> to vector<1x23xi32>
    %c6_131 = arith.constant 6 : index
    %c0_132 = arith.constant 0 : index
    %337 = vector.load %arg10[%c6_131, %c0_132] : memref<8x23xi32, #tpu.memory_space<vmem>>, vector<1x23xi32>
    tpu.vector_store %arg10[%c6_131, %c0_132], %336 {strides = array<i32>} : memref<8x23xi32, #tpu.memory_space<vmem>>, vector<1x23xi32>,
    %338 = vector.shape_cast %329 : vector<23xf32> to vector<1x23xf32>
    %339 = vector.extract_strided_slice %234 {offsets = [6, 0], sizes = [1, 23], strides = [1, 1]} : vector<8x23xf32> to vector<1x23xf32>
    %340 = arith.addf %338, %339 : vector<1x23xf32>
    %341 = vector.broadcast %340 : vector<1x23xf32> to vector<23x23xf32>
    %342 = arith.addf %235, %341 : vector<23x23xf32>
    %cst_133 = arith.constant dense<0xFF800000> : vector<23xf32>
    %343 = vector.multi_reduction <maximumf>, %342, %cst_133 [1] : vector<23x23xf32> to vector<23xf32>
    %344 = vector.shape_cast %343 : vector<23xf32> to vector<23x1xf32>
    %345 = vector.broadcast %344 : vector<23x1xf32> to vector<23x23xf32>
    %346 = arith.cmpf oeq, %342, %345 : vector<23x23xf32>
    %c23_i32_134 = arith.constant 23 : i32
    %347 = vector.broadcast %c23_i32_134 : i32 to vector<23x23xi32>
    %348 = arith.select %346, %242, %347 : vector<23x23xi1>, vector<23x23xi32>
    %cst_135 = arith.constant dense<2147483647> : vector<23xi32>
    %349 = vector.multi_reduction <minsi>, %348, %cst_135 [1] : vector<23x23xi32> to vector<23xi32>
    %350 = vector.shape_cast %349 : vector<23xi32> to vector<1x23xi32>
    %c7_136 = arith.constant 7 : index
    %c0_137 = arith.constant 0 : index
    %351 = vector.load %arg10[%c7_136, %c0_137] : memref<8x23xi32, #tpu.memory_space<vmem>>, vector<1x23xi32>
    tpu.vector_store %arg10[%c7_136, %c0_137], %350 {strides = array<i32>} : memref<8x23xi32, #tpu.memory_space<vmem>>, vector<1x23xi32>,
    %352 = vector.shape_cast %343 : vector<23xf32> to vector<1x23xf32>
    %353 = vector.extract_strided_slice %234 {offsets = [7, 0], sizes = [1, 23], strides = [1, 1]} : vector<8x23xf32> to vector<1x23xf32>
    %354 = arith.addf %352, %353 : vector<1x23xf32>
    %c0_138 = arith.constant 0 : index
    %c0_139 = arith.constant 0 : index
    %355 = vector.load %arg9[%c0_138, %c0_139] : memref<1x23xf32, #tpu.memory_space<vmem>>, vector<1x23xf32>
    %356 = arith.addf %354, %355 : vector<1x23xf32>
    %c0_140 = arith.constant 0 : index
    %c0_141 = arith.constant 0 : index
    %357 = vector.load %arg11[%c0_140, %c0_141] : memref<1x23xf32, #tpu.memory_space<vmem>>, vector<1x23xf32>
    tpu.vector_store %arg11[%c0_140, %c0_141], %356 {strides = array<i32>} : memref<1x23xf32, #tpu.memory_space<vmem>>, vector<1x23xf32>,
    return
  }
}

</mosaic_0001>

<bundles_post_ra>
// kernel: custom-call.2
= control target key start
LH: loop header
LB: loop body
LE: loop exit
PB: predicated region body
PF: predicated region fallthrough
CT: control target
= control target key end

     0   :  { %s6_s0 = inlined_call_operand.vmem [shape: s32[8], index: 0, kind: output, shape index: {}]  }

// kernel: _forward_impl.1
= control target key start
LH: loop header
LB: loop body
LE: loop exit
PB: predicated region body
PF: predicated region fallthrough
CT: control target
= control target key end

     0   :  { %vm53_vm0 = vcmask 1041408   ;;  %vm102_vm1 = vcmask 261120   ;;  %vm49_vm2 = vcmask 408576   ;;  %v78_v13 = vlaneseq  ;;  %s2651_s1 = inlined_call_operand.vmem [shape: f32[50,128], index: 1, kind: input, shape index: {}]   ;;  %s2652_s3 = inlined_call_operand.vmem [shape: f32[32,128], index: 3, kind: input, shape index: {}]   ;;  %s2653_s2 = inlined_call_operand.vmem [shape: f32[1,128], index: 2, kind: input, shape index: {}]   ;;  %s2654_s4 = inlined_call_operand.vmem [shape: f32[1,32], index: 4, kind: input, shape index: {}]   ;;  %s2655_s0 = inlined_call_operand.vmem [shape: f32[8,50], index: 0, kind: input, shape index: {}]   ;;  %s2656_s5 = inlined_call_operand.vmem [shape: f32[1,32], index: 5, kind: input, shape index: {}]   ;;  %s2657_s7 = inlined_call_operand.vmem [shape: f32[1,23], index: 7, kind: input, shape index: {}]   ;;  %s2658_s6 = inlined_call_operand.vmem [shape: f32[32,23], index: 6, kind: input, shape index: {}]   ;;  %s2659_s8 = inlined_call_operand.vmem [shape: f32[23,23], index: 8, kind: input, shape index: {}]   ;;  %s2660_s10 = inlined_call_operand.vmem [shape: s32[8,23], index: 10, kind: output, shape index: {0}]   ;;  %s2661_s9 = inlined_call_operand.vmem [shape: f32[1,23], index: 9, kind: input, shape index: {}]   ;;  %s2662_s11 = inlined_call_operand.vmem [shape: f32[1,23], index: 11, kind: output, shape index: {1}]  }
   0x1   :  { %v44_v0 = vld [vmem:[%s2651_s1 + $0x30] sm:$0x3]  ;;  %v43_v1 = vld [vmem:[%s2651_s1 + $0x28] sm:$0xff]  ;;  %v42_v2 = vld [vmem:[%s2651_s1 + $0x20] sm:$0xff]  ;;  %vm173_vm8 = vcmask 122880   ;;  %vm175_vm9 = vcmask 254080  }
   0x2   :  { %1692 = vmatpush.msk.msra.mxu0 %vm53_vm0, %v44_v0  ;;  %v96_v3 = vld [vmem:[%s2652_s3 + $0x18] sm:$0xff]  ;;  %v95_v4 = vld [vmem:[%s2652_s3 + $0x10] sm:$0xff]  ;;  %v94_v6 = vld [vmem:[%s2652_s3 + $0x8] sm:$0xff]  ;;  %v1926_v16 = vand.u32 127, %v78_v13 }
   0x3   :  { %118 = vmatpush.msra.mxu1 %v96_v3  ;;  %v41_v5 = vld [vmem:[%s2651_s1 + $0x18] sm:$0xff]  ;;  %194 = vmatpush.msra.mxu2 %v96_v3  ;;  %v40_v7 = vld [vmem:[%s2651_s1 + $0x10] sm:$0xff]  ;;  %v93_v8 = vld [vmem:[%s2652_s3] sm:$0xff] }
   0x4   :  { %67 = vmatpush.msra.mxu0 %v43_v1  ;;  %263 = vmatpush.msra.mxu3 %v96_v3  ;;  %v97_v9 = vld [vmem:[%s2654_s4] sm:$0x1]  ;;  %v39_v10 = vld [vmem:[%s2651_s1 + $0x8] sm:$0xff]  ;;  %v84_v18 = vand.u32 31, %v1926_v16 }
   0x5   :  { %119 = vmatpush.msra.mxu1 %v95_v4  ;;  %195 = vmatpush.msra.mxu2 %v95_v4  ;;  %v38_v11 = vld [vmem:[%s2651_s1] sm:$0xff] }
   0x6   :  { %68 = vmatpush.msra.mxu0 %v42_v2  ;;  %264 = vmatpush.msra.mxu3 %v95_v4  ;;  %v37_v12 = vld [vmem:[%s2655_s0] sm:$0xff]  ;;  %vm1929_vm3 = vcmp.lt.s32.totalorder %v84_v18, 16 }
   0x7   :  { %120 = vmatpush.msra.mxu1 %v94_v6  ;;  %196 = vmatpush.msra.mxu2 %v94_v6  ;;  %v1747_v14 = vld [vmem:[%s2653_s2] ss:$0 sm:$0xff]  ;;  %s1818_s2 = smov 32  }
   0x8   :  { %69 = vmatpush.msra.mxu0 %v41_v5  ;;  %265 = vmatpush.msra.mxu3 %v94_v6  ;;  %v1748_v26 = vld [vmem:[%s2656_s5] ss:$0 sm:$0xff]  ;;  %s1819_s5 = smov 64  }
   0x9   :  { %121 = vmatpush.msra.mxu1 %v93_v8  ;;  %197 = vmatpush.msra.mxu2 %v93_v8 }
   0xa   :  { %70 = vmatpush.msra.mxu0 %v40_v7  ;;  %1694 = vmatmul.msk.f32.vlgmr.msra.gmra.mxu1 %vm102_vm1, %v97_v9 }
   0xb   :  { %266 = vmatpush.msra.mxu3 %v93_v8  ;;  %332 = vmatpush.msrb.mxu1 %v96_v3 }
   0xc   :  { %71 = vmatpush.msra.mxu0 %v39_v10  ;;  %401 = vmatpush.msrb.mxu2 %v96_v3 }
   0xd   :  { %470 = vmatpush.msrb.mxu3 %v96_v3  ;;  %333 = vmatpush.msrb.mxu1 %v95_v4 }
   0xe   :  { %72 = vmatpush.msra.mxu0 %v38_v11  ;;  %402 = vmatpush.msrb.mxu2 %v95_v4 }
   0xf   :  { %1693 = vmatmul.msk.f32.vlgmr.msra.gmra.mxu0 %vm49_vm2, %v37_v12  ;;  %471 = vmatpush.msrb.mxu3 %v95_v4 }
  0x10   :  { %334 = vmatpush.msrb.mxu1 %v94_v6  ;;  %539 = vmatpush.msrb.mxu0 %v96_v3 }
  0x11   :  { %403 = vmatpush.msrb.mxu2 %v94_v6  ;;  %472 = vmatpush.msrb.mxu3 %v94_v6 }
  0x12   :  { %335 = vmatpush.msrb.mxu1 %v93_v8  ;;  %540 = vmatpush.msrb.mxu0 %v95_v4 }
  0x13   :  { %404 = vmatpush.msrb.mxu2 %v93_v8  ;;  %473 = vmatpush.msrb.mxu3 %v93_v8 }
  0x14   :  { %541 = vmatpush.msrb.mxu0 %v94_v6  ;;  %608 = vmatpush.msra.mxu1 %v96_v3 }
  0x16   :  { %542 = vmatpush.msrb.mxu0 %v93_v8  ;;  %609 = vmatpush.msra.mxu1 %v95_v4 }
  0x18   :  { %610 = vmatpush.msra.mxu1 %v94_v6 }
  0x1a   :  { %611 = vmatpush.msra.mxu1 %v93_v8 }
  0x87   :  { %v123_v20 = vpop.f32.mrf.mxu1 }
  0x8c   :  { %v74_v15 = vpop.f32.mrf.mxu0 }
  0x8d   :  { %v75_v17 = vadd.f32 %v1747_v14, %v74_v15 }
  0x8f   :  { %77 = vst [vmem:[#allocation2] sm:$0xff] %v75_v17 }
  0x96   :  { %v99_v21 = vld [vmem:[#allocation2] sm:$0x1]  ;;  %v100_v22 = vld [vmem:[#allocation2 + $0x7] sm:$0x1]  ;;  %v177_v50 = vld [vmem:[#allocation2 + $0x1] sm:$0x1] }
  0x97   :  { %v101_v23 = vsel %vm1929_vm3, %v99_v21, %v100_v22  ;;  %v178_v51 = vld [vmem:[#allocation2 + $0x6] sm:$0x1]  ;;  %v246_v15 = vld [vmem:[#allocation2 + $0x2] sm:$0x1]  ;;  %v247_v17 = vld [vmem:[#allocation2 + $0x5] sm:$0x1] }
  0x98   :  { %v126_v24 = vadd.f32 %v123_v20, %v101_v23  ;;  %v179_v52 = vsel %vm1929_vm3, %v177_v50, %v178_v51  ;;  %v248_v18 = vsel %vm1929_vm3, %v246_v15, %v247_v17 }
  0x9a   :  { %1751 = vtanh.f32 %v126_v24  ;;  %v1695_v27 = vmul.f32 -1.442695, %v126_v24 }
  0x9c   :  { %1753 = vpow2.f32 %v1695_v27 }
  0xa0   :  { %v1752_v25 = vpop.eup %1751 }
  0xa1   :  { %154 = vrot.lane.b32.xlu0 %v1752_v25, %s1818_s2 }
  0xa2   :  { %v1754_v28 = vpop.eup %1753 }
  0xa3   :  { %v130_v29 = vadd.f32 1.0, %v1754_v28 }
  0xa5   :  { %1755 = vrcp.f32 %v130_v29  ;;  %v142_v35 = vand.u32 2147483648, %v130_v29  ;;  %vm136_vm5 = vweird.f32 %v130_v29  ;;  %v140_v36 = vand.u32 2147483647, %v130_v29 }
  0xa7   :  { %v143_v38 = vor.u32 1.1754944e-38, %v142_v35  ;;  %vm141_vm7 = vcmp.eq.f32.partialorder %v140_v36, 8.507059e+37 }
  0xa9   :  { %149 = vrot.lane.b32.xlu0 %v1748_v26, %s1818_s2 }
  0xab   :  { %v1756_v30 = vpop.eup %1755 }
  0xac   :  { %v132_v31 = vmul.f32 %v1756_v30, %v130_v29  ;;  %vm137_vm4 = vweird.f32 %v1756_v30 }
  0xad   :  { %vm138_vm6 = vmor %vm136_vm5, %vm137_vm4 }
  0xae   :  { %v133_v32 = vsub.f32 1.0, %v132_v31 }
  0xb0   :  { %v134_v33 = vmul.f32 %v1756_v30, %v133_v32 }
  0xb2   :  { %v135_v34 = vadd.f32 %v1756_v30, %v134_v33 }
  0xb4   :  { %v139_v37 = vsel %vm138_vm6, %v1756_v30, %v135_v34 }
  0xb5   :  { %v144_v40 = vsel %vm141_vm7, %v143_v38, %v139_v37 }
 0x113   :  { %v155_v39 = vpop.permute.xlu0 %154 }
 0x114   :  { %v157_v41 = vmul.f32 %v155_v39, %v144_v40 }
 0x116   :  { %159 = vrot.lane.b32.xlu1 %v157_v41, %s1818_s2 }
 0x11b   :  { %v150_v42 = vpop.permute.xlu0 %149 }
 0x11c   :  { %v152_v43 = vmul.f32 %v150_v42, %v144_v40 }
 0x188   :  { %v160_v44 = vpop.permute.xlu1 %159 }
 0x189   :  { %v162_v45 = vadd.f32 %v160_v44, %v152_v43 }
 0x18b   :  { %1757 = vtanh.f32 %v162_v45 }
 0x191   :  { %v1758_v46 = vpop.eup %1757 }
 0x192   :  { %165 = vrot.lane.b32.xlu1 %v1758_v46, %s1818_s2  ;;  %v316_v46 = vld [vmem:[#allocation2 + $0x4] sm:$0x1] }
 0x204   :  { %v166_v47 = vpop.permute.xlu1 %165 }
 0x205   :  { %v168_v48 = vmul.f32 %v166_v47, %v144_v40 }
 0x207   :  { %170 = vrot.lane.b32.xlu2 %v168_v48, %s1819_s5 }
 0x261   :  { %v171_v49 = vpop.permute.xlu2 %170 }
 0x262   :  { %1696 = vmatmul.msk.f32.vlgmr.msra.gmra.mxu2 %vm102_vm1, %v171_v49  ;;  %174 = vst.msk [vmem:[#allocation3] sm:$0x1] %vm173_vm8, %v171_v49 }
 0x263   :  { %176 = vst.msk [vmem:[#allocation3 + $0x7] sm:$0x1] %vm175_vm9, %v171_v49 }
 0x2e5   :  { %v199_v53 = vpop.f32.mrf.mxu2 }
 0x2e6   :  { %v202_v54 = vadd.f32 %v199_v53, %v179_v52 }
 0x2e8   :  { %1759 = vtanh.f32 %v202_v54  ;;  %v1697_v56 = vmul.f32 -1.442695, %v202_v54 }
 0x2ea   :  { %1761 = vpow2.f32 %v1697_v56 }
 0x2ee   :  { %v1760_v55 = vpop.eup %1759 }
 0x2ef   :  { %225 = vrot.lane.b32.xlu2 %v1760_v55, %s1818_s2 }
 0x2f0   :  { %v1762_v57 = vpop.eup %1761 }
 0x2f1   :  { %v206_v58 = vadd.f32 1.0, %v1762_v57 }
 0x2f3   :  { %1763 = vrcp.f32 %v206_v58  ;;  %v218_v0 = vand.u32 2147483648, %v206_v58  ;;  %vm212_vm11 = vweird.f32 %v206_v58  ;;  %v216_v1 = vand.u32 2147483647, %v206_v58 }
 0x2f5   :  { %v219_v3 = vor.u32 1.1754944e-38, %v218_v0  ;;  %vm217_vm13 = vcmp.eq.f32.partialorder %v216_v1, 8.507059e+37 }
 0x2f9   :  { %v1764_v59 = vpop.eup %1763 }
 0x2fa   :  { %v208_v60 = vmul.f32 %v1764_v59, %v206_v58  ;;  %vm213_vm10 = vweird.f32 %v1764_v59 }
 0x2fb   :  { %vm214_vm12 = vmor %vm212_vm11, %vm213_vm10 }
 0x2fc   :  { %v209_v61 = vsub.f32 1.0, %v208_v60 }
 0x2fe   :  { %v210_v62 = vmul.f32 %v1764_v59, %v209_v61 }
 0x300   :  { %v211_v63 = vadd.f32 %v1764_v59, %v210_v62 }
 0x302   :  { %v215_v2 = vsel %vm214_vm12, %v1764_v59, %v211_v63 }
 0x303   :  { %v220_v5 = vsel %vm217_vm13, %v219_v3, %v215_v2 }
 0x304   :  { %v223_v7 = vmul.f32 %v220_v5, %v162_v45  ;;  %v315_v45 = vld [vmem:[#allocation2 + $0x3] sm:$0x1] }
 0x305   :  { %v317_v47 = vsel %vm1929_vm3, %v315_v45, %v316_v46 }
 0x349   :  { %v226_v4 = vpop.permute.xlu2 %225 }
 0x34a   :  { %v228_v6 = vmul.f32 %v226_v4, %v220_v5 }
 0x34c   :  { %230 = vrot.lane.b32.xlu0 %v228_v6, %s1818_s2 }
 0x3be   :  { %v231_v8 = vpop.permute.xlu0 %230 }
 0x3bf   :  { %v233_v9 = vadd.f32 %v231_v8, %v223_v7 }
 0x3c1   :  { %1765 = vtanh.f32 %v233_v9 }
 0x3c7   :  { %v1766_v10 = vpop.eup %1765 }
 0x3c8   :  { %236 = vrot.lane.b32.xlu1 %v1766_v10, %s1818_s2  ;;  %v385_v10 = vld [vmem:[#allocation2 + $0x3] sm:$0x1] }
 0x43a   :  { %v237_v11 = vpop.permute.xlu1 %236 }
 0x43b   :  { %v239_v12 = vmul.f32 %v237_v11, %v220_v5 }
 0x43d   :  { %241 = vrot.lane.b32.xlu2 %v239_v12, %s1819_s5 }
 0x497   :  { %v242_v14 = vpop.permute.xlu2 %241 }
 0x498   :  { %1698 = vmatmul.msk.f32.vlgmr.msra.gmra.mxu3 %vm102_vm1, %v242_v14  ;;  %244 = vst.msk [vmem:[#allocation3 + $0x1] sm:$0x1] %vm173_vm8, %v242_v14 }
 0x499   :  { %245 = vst.msk [vmem:[#allocation3 + $0x6] sm:$0x1] %vm175_vm9, %v242_v14 }
 0x51b   :  { %v268_v20 = vpop.f32.mrf.mxu3 }
 0x51c   :  { %v271_v21 = vadd.f32 %v268_v20, %v248_v18 }
 0x51e   :  { %1767 = vtanh.f32 %v271_v21  ;;  %v1699_v23 = vmul.f32 -1.442695, %v271_v21 }
 0x520   :  { %1769 = vpow2.f32 %v1699_v23 }
 0x524   :  { %v1768_v22 = vpop.eup %1767 }
 0x525   :  { %294 = vrot.lane.b32.xlu0 %v1768_v22, %s1818_s2 }
 0x526   :  { %v1770_v24 = vpop.eup %1769 }
 0x527   :  { %v275_v25 = vadd.f32 1.0, %v1770_v24 }
 0x529   :  { %1771 = vrcp.f32 %v275_v25  ;;  %v287_v31 = vand.u32 2147483648, %v275_v25  ;;  %vm281_vm15 = vweird.f32 %v275_v25  ;;  %v285_v32 = vand.u32 2147483647, %v275_v25 }
 0x52b   :  { %v288_v34 = vor.u32 1.1754944e-38, %v287_v31  ;;  %vm286_vm2 = vcmp.eq.f32.partialorder %v285_v32, 8.507059e+37 }
 0x52f   :  { %v1772_v26 = vpop.eup %1771 }
 0x530   :  { %v277_v27 = vmul.f32 %v1772_v26, %v275_v25  ;;  %vm282_vm14 = vweird.f32 %v1772_v26 }
 0x531   :  { %vm283_vm0 = vmor %vm281_vm15, %vm282_vm14 }
 0x532   :  { %v278_v28 = vsub.f32 1.0, %v277_v27 }
 0x534   :  { %v279_v29 = vmul.f32 %v1772_v26, %v278_v28 }
 0x536   :  { %v280_v30 = vadd.f32 %v1772_v26, %v279_v29 }
 0x538   :  { %v284_v33 = vsel %vm283_vm0, %v1772_v26, %v280_v30 }
 0x539   :  { %v289_v36 = vsel %vm286_vm2, %v288_v34, %v284_v33 }
 0x53a   :  { %v292_v38 = vmul.f32 %v289_v36, %v233_v9  ;;  %v384_v9 = vld [vmem:[#allocation2 + $0x4] sm:$0x1] }
 0x53b   :  { %v386_v11 = vsel %vm1929_vm3, %v384_v9, %v385_v10 }
 0x597   :  { %v295_v35 = vpop.permute.xlu0 %294 }
 0x598   :  { %v297_v37 = vmul.f32 %v295_v35, %v289_v36 }
 0x59a   :  { %299 = vrot.lane.b32.xlu1 %v297_v37, %s1818_s2 }
 0x60c   :  { %v300_v39 = vpop.permute.xlu1 %299 }
 0x60d   :  { %v302_v40 = vadd.f32 %v300_v39, %v292_v38 }
 0x60f   :  { %1773 = vtanh.f32 %v302_v40 }
 0x615   :  { %v1774_v41 = vpop.eup %1773 }
 0x616   :  { %305 = vrot.lane.b32.xlu2 %v1774_v41, %s1818_s2  ;;  %v454_v41 = vld [vmem:[#allocation2 + $0x2] sm:$0x1] }
 0x670   :  { %v306_v42 = vpop.permute.xlu2 %305 }
 0x671   :  { %v308_v43 = vmul.f32 %v306_v42, %v289_v36 }
 0x673   :  { %310 = vrot.lane.b32.xlu0 %v308_v43, %s1819_s5 }
 0x6e5   :  { %v311_v44 = vpop.permute.xlu0 %310 }
 0x6e6   :  { %313 = vst.msk [vmem:[#allocation3 + $0x2] sm:$0x1] %vm173_vm8, %v311_v44  ;;  %1700 = vmatmul.msk.f32.vlgmr.msrb.gmra.mxu1 %vm102_vm1, %v311_v44 }
 0x6e7   :  { %314 = vst.msk [vmem:[#allocation3 + $0x5] sm:$0x1] %vm175_vm9, %v311_v44 }
 0x763   :  { %v337_v48 = vpop.f32.mrf.mxu1 }
 0x764   :  { %v340_v49 = vadd.f32 %v337_v48, %v317_v47 }
 0x766   :  { %1775 = vtanh.f32 %v340_v49  ;;  %v1701_v51 = vmul.f32 -1.442695, %v340_v49 }
 0x768   :  { %1777 = vpow2.f32 %v1701_v51 }
 0x76c   :  { %v1776_v50 = vpop.eup %1775 }
 0x76d   :  { %363 = vrot.lane.b32.xlu1 %v1776_v50, %s1818_s2 }
 0x76e   :  { %v1778_v52 = vpop.eup %1777 }
 0x76f   :  { %v344_v53 = vadd.f32 1.0, %v1778_v52 }
 0x771   :  { %1779 = vrcp.f32 %v344_v53  ;;  %v356_v59 = vand.u32 2147483648, %v344_v53  ;;  %vm350_vm5 = vweird.f32 %v344_v53  ;;  %v354_v60 = vand.u32 2147483647, %v344_v53 }
 0x773   :  { %v357_v62 = vor.u32 1.1754944e-38, %v356_v59  ;;  %vm355_vm7 = vcmp.eq.f32.partialorder %v354_v60, 8.507059e+37 }
 0x777   :  { %v1780_v54 = vpop.eup %1779 }
 0x778   :  { %v346_v55 = vmul.f32 %v1780_v54, %v344_v53  ;;  %vm351_vm4 = vweird.f32 %v1780_v54 }
 0x779   :  { %vm352_vm6 = vmor %vm350_vm5, %vm351_vm4 }
 0x77a   :  { %v347_v56 = vsub.f32 1.0, %v346_v55 }
 0x77c   :  { %v348_v57 = vmul.f32 %v1780_v54, %v347_v56 }
 0x77e   :  { %v349_v58 = vadd.f32 %v1780_v54, %v348_v57 }
 0x780   :  { %v353_v61 = vsel %vm352_vm6, %v1780_v54, %v349_v58 }
 0x781   :  { %v358_v0 = vsel %vm355_vm7, %v357_v62, %v353_v61 }
 0x782   :  { %v361_v2 = vmul.f32 %v358_v0, %v302_v40  ;;  %v453_v40 = vld [vmem:[#allocation2 + $0x5] sm:$0x1] }
 0x783   :  { %v455_v42 = vsel %vm1929_vm3, %v453_v40, %v454_v41 }
 0x7df   :  { %v364_v63 = vpop.permute.xlu1 %363 }
 0x7e0   :  { %v366_v1 = vmul.f32 %v364_v63, %v358_v0 }
 0x7e2   :  { %368 = vrot.lane.b32.xlu2 %v366_v1, %s1818_s2 }
 0x83c   :  { %v369_v3 = vpop.permute.xlu2 %368 }
 0x83d   :  { %v371_v4 = vadd.f32 %v369_v3, %v361_v2 }
 0x83f   :  { %1781 = vtanh.f32 %v371_v4 }
 0x845   :  { %v1782_v5 = vpop.eup %1781 }
 0x846   :  { %374 = vrot.lane.b32.xlu0 %v1782_v5, %s1818_s2  ;;  %v523_v5 = vld [vmem:[#allocation2 + $0x1] sm:$0x1] }
 0x8b8   :  { %v375_v6 = vpop.permute.xlu0 %374 }
 0x8b9   :  { %v377_v7 = vmul.f32 %v375_v6, %v358_v0 }
 0x8bb   :  { %379 = vrot.lane.b32.xlu1 %v377_v7, %s1819_s5 }
 0x92d   :  { %v380_v8 = vpop.permute.xlu1 %379 }
 0x92e   :  { %382 = vst.msk [vmem:[#allocation3 + $0x3] sm:$0x1] %vm173_vm8, %v380_v8  ;;  %1702 = vmatmul.msk.f32.vlgmr.msrb.gmra.mxu2 %vm102_vm1, %v380_v8 }
 0x92f   :  { %383 = vst.msk [vmem:[#allocation3 + $0x4] sm:$0x1] %vm175_vm9, %v380_v8 }
 0x9b1   :  { %v406_v12 = vpop.f32.mrf.mxu2 }
 0x9b2   :  { %v409_v14 = vadd.f32 %v406_v12, %v386_v11 }
 0x9b4   :  { %1783 = vtanh.f32 %v409_v14  ;;  %v1703_v17 = vmul.f32 -1.442695, %v409_v14 }
 0x9b6   :  { %1785 = vpow2.f32 %v1703_v17 }
 0x9ba   :  { %v1784_v15 = vpop.eup %1783 }
 0x9bb   :  { %432 = vrot.lane.b32.xlu2 %v1784_v15, %s1818_s2 }
 0x9bc   :  { %v1786_v18 = vpop.eup %1785 }
 0x9bd   :  { %v413_v20 = vadd.f32 1.0, %v1786_v18 }
 0x9bf   :  { %1787 = vrcp.f32 %v413_v20  ;;  %v425_v26 = vand.u32 2147483648, %v413_v20  ;;  %vm419_vm11 = vweird.f32 %v413_v20  ;;  %v423_v27 = vand.u32 2147483647, %v413_v20 }
 0x9c1   :  { %v426_v29 = vor.u32 1.1754944e-38, %v425_v26  ;;  %vm424_vm13 = vcmp.eq.f32.partialorder %v423_v27, 8.507059e+37 }
 0x9c5   :  { %v1788_v21 = vpop.eup %1787 }
 0x9c6   :  { %v415_v22 = vmul.f32 %v1788_v21, %v413_v20  ;;  %vm420_vm10 = vweird.f32 %v1788_v21 }
 0x9c7   :  { %vm421_vm12 = vmor %vm419_vm11, %vm420_vm10 }
 0x9c8   :  { %v416_v23 = vsub.f32 1.0, %v415_v22 }
 0x9ca   :  { %v417_v24 = vmul.f32 %v1788_v21, %v416_v23 }
 0x9cc   :  { %v418_v25 = vadd.f32 %v1788_v21, %v417_v24 }
 0x9ce   :  { %v422_v28 = vsel %vm421_vm12, %v1788_v21, %v418_v25 }
 0x9cf   :  { %v427_v31 = vsel %vm424_vm13, %v426_v29, %v422_v28  ;;  %vm695_vm13 = vcmp.eq.s32.totalorder %v1926_v16, 21 }
 0x9d0   :  { %v430_v33 = vmul.f32 %v427_v31, %v371_v4  ;;  %v522_v4 = vld [vmem:[#allocation2 + $0x6] sm:$0x1] }
 0x9d1   :  { %v524_v6 = vsel %vm1929_vm3, %v522_v4, %v523_v5  ;;  %v2032_v5 = vld [vmem:[%s2659_s8 + $0x8] sm:$0xff] }
 0xa15   :  { %v433_v30 = vpop.permute.xlu2 %432 }
 0xa16   :  { %v435_v32 = vmul.f32 %v433_v30, %v427_v31 }
 0xa18   :  { %437 = vrot.lane.b32.xlu0 %v435_v32, %s1818_s2 }
 0xa8a   :  { %v438_v34 = vpop.permute.xlu0 %437 }
 0xa8b   :  { %v440_v35 = vadd.f32 %v438_v34, %v430_v33 }
 0xa8d   :  { %1789 = vtanh.f32 %v440_v35 }
 0xa93   :  { %v1790_v36 = vpop.eup %1789 }
 0xa94   :  { %443 = vrot.lane.b32.xlu1 %v1790_v36, %s1818_s2  ;;  %v592_v36 = vld [vmem:[#allocation2] sm:$0x1] }
 0xb06   :  { %v444_v37 = vpop.permute.xlu1 %443 }
 0xb07   :  { %v446_v38 = vmul.f32 %v444_v37, %v427_v31 }
 0xb09   :  { %448 = vrot.lane.b32.xlu2 %v446_v38, %s1819_s5 }
 0xb63   :  { %v449_v39 = vpop.permute.xlu2 %448 }
 0xb64   :  { %451 = vst.msk [vmem:[#allocation3 + $0x4] sm:$0x1] %vm173_vm8, %v449_v39  ;;  %1704 = vmatmul.msk.f32.vlgmr.msrb.gmra.mxu3 %vm102_vm1, %v449_v39 }
 0xb65   :  { %452 = vst.msk [vmem:[#allocation3 + $0x3] sm:$0x1] %vm175_vm9, %v449_v39 }
 0xbe7   :  { %v475_v43 = vpop.f32.mrf.mxu3 }
 0xbe8   :  { %v478_v44 = vadd.f32 %v475_v43, %v455_v42 }
 0xbea   :  { %1791 = vtanh.f32 %v478_v44  ;;  %v1705_v46 = vmul.f32 -1.442695, %v478_v44 }
 0xbec   :  { %1793 = vpow2.f32 %v1705_v46 }
 0xbf0   :  { %v1792_v45 = vpop.eup %1791 }
 0xbf1   :  { %501 = vrot.lane.b32.xlu0 %v1792_v45, %s1818_s2 }
 0xbf2   :  { %v1794_v47 = vpop.eup %1793 }
 0xbf3   :  { %v482_v48 = vadd.f32 1.0, %v1794_v47 }
 0xbf5   :  { %1795 = vrcp.f32 %v482_v48  ;;  %v494_v54 = vand.u32 2147483648, %v482_v48  ;;  %vm488_vm15 = vweird.f32 %v482_v48  ;;  %v492_v55 = vand.u32 2147483647, %v482_v48 }
 0xbf7   :  { %v495_v57 = vor.u32 1.1754944e-38, %v494_v54  ;;  %vm493_vm2 = vcmp.eq.f32.partialorder %v492_v55, 8.507059e+37 }
 0xbfb   :  { %v1796_v49 = vpop.eup %1795 }
 0xbfc   :  { %v484_v50 = vmul.f32 %v1796_v49, %v482_v48  ;;  %vm489_vm14 = vweird.f32 %v1796_v49 }
 0xbfd   :  { %vm490_vm0 = vmor %vm488_vm15, %vm489_vm14  ;;  %vm707_vm14 = vcmask 186368   ;;  %vm700_vm15 = vcmask 187392  }
 0xbfe   :  { %v485_v51 = vsub.f32 1.0, %v484_v50 }
 0xc00   :  { %v486_v52 = vmul.f32 %v1796_v49, %v485_v51 }
 0xc02   :  { %v487_v53 = vadd.f32 %v1796_v49, %v486_v52 }
 0xc04   :  { %v491_v56 = vsel %vm490_vm0, %v1796_v49, %v487_v53 }
 0xc05   :  { %v496_v59 = vsel %vm493_vm2, %v495_v57, %v491_v56 }
 0xc06   :  { %v499_v61 = vmul.f32 %v496_v59, %v440_v35  ;;  %v591_v35 = vld [vmem:[#allocation2 + $0x7] sm:$0x1] }
 0xc07   :  { %v593_v37 = vsel %vm1929_vm3, %v591_v35, %v592_v36 }
 0xc63   :  { %v502_v58 = vpop.permute.xlu0 %501 }
 0xc64   :  { %v504_v60 = vmul.f32 %v502_v58, %v496_v59 }
 0xc66   :  { %506 = vrot.lane.b32.xlu1 %v504_v60, %s1818_s2 }
 0xcd8   :  { %v507_v62 = vpop.permute.xlu1 %506 }
 0xcd9   :  { %v509_v63 = vadd.f32 %v507_v62, %v499_v61  ;;  %v664_v61 = vld [vmem:[%s2658_s6 + $0x18] sm:$0xff]  ;;  %v663_v62 = vld [vmem:[%s2658_s6 + $0x10] sm:$0xff] }
 0xcda   :  { %684 = vmatpush.msra.mxu2 %v664_v61 }
 0xcdb   :  { %1797 = vtanh.f32 %v509_v63 }
 0xcdc   :  { %685 = vmatpush.msra.mxu2 %v663_v62 }
 0xce1   :  { %v1798_v0 = vpop.eup %1797 }
 0xce2   :  { %512 = vrot.lane.b32.xlu2 %v1798_v0, %s1818_s2  ;;  %v661_v0 = vld [vmem:[%s2658_s6] sm:$0xff] }
 0xd3c   :  { %v513_v1 = vpop.permute.xlu2 %512 }
 0xd3d   :  { %v515_v2 = vmul.f32 %v513_v1, %v496_v59  ;;  %v2021_v1 = vld [vmem:[%s2659_s8 + $0x10] sm:$0x7f] }
 0xd3f   :  { %517 = vrot.lane.b32.xlu0 %v515_v2, %s1819_s5  ;;  %v2027_v2 = vld [vmem:[%s2659_s8] sm:$0xff] }
 0xdb1   :  { %v518_v3 = vpop.permute.xlu0 %517 }
 0xdb2   :  { %520 = vst.msk [vmem:[#allocation3 + $0x5] sm:$0x1] %vm173_vm8, %v518_v3  ;;  %1706 = vmatmul.msk.f32.vlgmr.msrb.gmra.mxu0 %vm102_vm1, %v518_v3 }
 0xdb3   :  { %521 = vst.msk [vmem:[#allocation3 + $0x2] sm:$0x1] %vm175_vm9, %v518_v3  ;;  %v1820_v3 = vmov -10000.0  }
 0xdb4   :  { %v696_v4 = vsel %vm695_vm13, 0.0, %v1820_v3 }
 0xe2f   :  { %v544_v7 = vpop.f32.mrf.mxu0 }
 0xe30   :  { %v547_v8 = vadd.f32 %v544_v7, %v524_v6  ;;  %v2035_v6 = vshrl.u32 %v78_v13, 7  ;;  %v2038_v7 = vadd.f32 %v696_v4, %v2021_v1 }
 0xe32   :  { %1799 = vtanh.f32 %v547_v8  ;;  %v1707_v10 = vmul.f32 -1.442695, %v547_v8  ;;  %v697_v8 = vadd.f32 %v696_v4, %v2027_v2  ;;  %1715 = vset.pattern.permute.xlu2 %v2035_v6  ;;  %v708_v13 = vsel %vm707_vm14, %v2038_v7, -inf }
 0xe34   :  { %1801 = vpow2.f32 %v1707_v10  ;;  %v2046_v10 = vadd.s32 16, %v2035_v6 }
 0xe36   :  { %1717 = vset.pattern.permute.xlu1 %v2046_v10 }
 0xe38   :  { %v1800_v9 = vpop.eup %1799 }
 0xe39   :  { %570 = vrot.lane.b32.xlu1 %v1800_v9, %s1818_s2  ;;  %v2042_v9 = vadd.f32 %v696_v4, %v2032_v5 }
 0xe3a   :  { %v1802_v11 = vpop.eup %1801 }
 0xe3b   :  { %v551_v12 = vadd.f32 1.0, %v1802_v11  ;;  %v2049_v11 = vadd.s32 8, %v2035_v6 }
 0xe3d   :  { %1803 = vrcp.f32 %v551_v12  ;;  %v563_v21 = vand.u32 2147483648, %v551_v12  ;;  %vm557_vm5 = vweird.f32 %v551_v12  ;;  %v561_v22 = vand.u32 2147483647, %v551_v12  ;;  %1716 = vset.pattern.permute.xlu0 %v2049_v11 }
 0xe3f   :  { %v564_v24 = vor.u32 1.1754944e-38, %v563_v21  ;;  %vm562_vm7 = vcmp.eq.f32.partialorder %v561_v22, 8.507059e+37 }
 0xe43   :  { %v1804_v14 = vpop.eup %1803 }
 0xe44   :  { %v553_v15 = vmul.f32 %v1804_v14, %v551_v12  ;;  %vm558_vm4 = vweird.f32 %v1804_v14  ;;  %v701_v12 = vsel %vm700_vm15, %v697_v8, -inf }
 0xe45   :  { %vm559_vm6 = vmor %vm557_vm5, %vm558_vm4 }
 0xe46   :  { %v554_v17 = vsub.f32 1.0, %v553_v15 }
 0xe48   :  { %v555_v18 = vmul.f32 %v1804_v14, %v554_v17 }
 0xe4a   :  { %v556_v20 = vadd.f32 %v1804_v14, %v555_v18  ;;  %v1749_v18 = vld [vmem:[%s2657_s7] ss:$0 sm:$0xff] }
 0xe4c   :  { %v560_v23 = vsel %vm559_vm6, %v1804_v14, %v556_v20  ;;  %v704_v14 = vsel %vm700_vm15, %v2042_v9, -inf }
 0xe4d   :  { %v565_v26 = vsel %vm562_vm7, %v564_v24, %v560_v23  ;;  %vm771_vm7 = vcmask 180224  }
 0xe4e   :  { %v568_v28 = vmul.f32 %v565_v26, %v509_v63  ;;  %v662_v63 = vld [vmem:[%s2658_s6 + $0x8] sm:$0xff] }
 0xe4f   :  { %686 = vmatpush.msra.mxu2 %v662_v63 }
 0xe51   :  { %687 = vmatpush.msra.mxu2 %v661_v0 }
 0xeab   :  { %v571_v25 = vpop.permute.xlu1 %570 }
 0xeac   :  { %v573_v27 = vmul.f32 %v571_v25, %v565_v26 }
 0xeae   :  { %575 = vrot.lane.b32.xlu2 %v573_v27, %s1818_s2 }
 0xf08   :  { %v576_v29 = vpop.permute.xlu2 %575 }
 0xf09   :  { %v578_v30 = vadd.f32 %v576_v29, %v568_v28 }
 0xf0b   :  { %1805 = vtanh.f32 %v578_v30 }
 0xf11   :  { %v1806_v31 = vpop.eup %1805 }
 0xf12   :  { %581 = vrot.lane.b32.xlu0 %v1806_v31, %s1818_s2 }
 0xf84   :  { %v582_v32 = vpop.permute.xlu0 %581 }
 0xf85   :  { %v584_v33 = vmul.f32 %v582_v32, %v565_v26  ;;  %v1821_v26 = vmov 0  }
 0xf87   :  { %586 = vrot.lane.b32.xlu1 %v584_v33, %s1819_s5 }
 0xff9   :  { %v587_v34 = vpop.permute.xlu1 %586 }
 0xffa   :  { %589 = vst.msk [vmem:[#allocation3 + $0x6] sm:$0x1] %vm173_vm8, %v587_v34  ;;  %1708 = vmatmul.msk.f32.vlgmr.msra.gmra.mxu1 %vm102_vm1, %v587_v34 }
 0xffb   :  { %590 = vst.msk [vmem:[#allocation3 + $0x1] sm:$0x1] %vm175_vm9, %v587_v34 }
0x1077   :  { %v613_v38 = vpop.f32.mrf.mxu1 }
0x1078   :  { %v616_v39 = vadd.f32 %v613_v38, %v593_v37 }
0x107a   :  { %1807 = vtanh.f32 %v616_v39  ;;  %v1709_v41 = vmul.f32 -1.442695, %v616_v39 }
0x107c   :  { %1809 = vpow2.f32 %v1709_v41 }
0x1080   :  { %v1808_v40 = vpop.eup %1807 }
0x1081   :  { %639 = vrot.lane.b32.xlu2 %v1808_v40, %s1818_s2 }
0x1082   :  { %v1810_v42 = vpop.eup %1809 }
0x1083   :  { %v620_v43 = vadd.f32 1.0, %v1810_v42 }
0x1085   :  { %1811 = vrcp.f32 %v620_v43  ;;  %v632_v49 = vand.u32 2147483648, %v620_v43  ;;  %vm626_vm11 = vweird.f32 %v620_v43  ;;  %v630_v19 = vand.u32 2147483647, %v620_v43 }
0x1087   :  { %v633_v51 = vor.u32 1.1754944e-38, %v632_v49  ;;  %vm631_vm12 = vcmp.eq.f32.partialorder %v630_v19, 8.507059e+37 }
0x108b   :  { %v1812_v44 = vpop.eup %1811 }
0x108c   :  { %v622_v45 = vmul.f32 %v1812_v44, %v620_v43  ;;  %vm627_vm10 = vweird.f32 %v1812_v44 }
0x108d   :  { %vm628_vm3 = vmor %vm626_vm11, %vm627_vm10 }
0x108e   :  { %v623_v46 = vsub.f32 1.0, %v622_v45  ;;  %v2097_v45 = vadd.s32 4294967280, %v1926_v16 }
0x1090   :  { %v624_v47 = vmul.f32 %v1812_v44, %v623_v46 }
0x1092   :  { %v625_v48 = vadd.f32 %v1812_v44, %v624_v47 }
0x1094   :  { %v629_v50 = vsel %vm628_vm3, %v1812_v44, %v625_v48  ;;  %v2094_v44 = vadd.s32 4294967288, %v1926_v16 }
0x1095   :  { %v634_v53 = vsel %vm631_vm12, %v633_v51, %v629_v50 }
0x1096   :  { %v637_v55 = vmul.f32 %v634_v53, %v578_v30 }
0x10db   :  { %v640_v52 = vpop.permute.xlu2 %639 }
0x10dc   :  { %v642_v54 = vmul.f32 %v640_v52, %v634_v53 }
0x10de   :  { %644 = vrot.lane.b32.xlu0 %v642_v54, %s1818_s2 }
0x1108   :  { %702 = vmax.xlane.f32.xlu0 %v701_v12 }
0x1150   :  { %v645_v56 = vpop.permute.xlu0 %644 }
0x1151   :  { %v647_v57 = vadd.f32 %v645_v56, %v637_v55 }
0x1153   :  { %1813 = vtanh.f32 %v647_v57 }
0x1159   :  { %v1814_v58 = vpop.eup %1813 }
0x115a   :  { %650 = vrot.lane.b32.xlu1 %v1814_v58, %s1818_s2 }
0x117b   :  { %v703_v28 = vpop.xlane.xlu0 %702 }
0x1184   :  { %705 = vmax.xlane.f32.xlu1 %v704_v14 }
0x11cc   :  { %v651_v59 = vpop.permute.xlu1 %650 }
0x11cd   :  { %v653_v60 = vmul.f32 %v651_v59, %v634_v53 }
0x11cf   :  { %655 = vrot.lane.b32.xlu2 %v653_v60, %s1819_s5 }
0x11f7   :  { %v706_v31 = vpop.xlane.xlu1 %705 }
0x11f8   :  { %709 = vmax.xlane.f32.xlu2 %v708_v13  ;;  %vm712_vm2 = vcmp.eq.f32.partialorder %v2042_v9, %v706_v31 }
0x11f9   :  { %v715_v62 = vsel %vm712_vm2, %v1926_v16, 23 }
0x11fa   :  { %v732_v0 = vsel %vm700_vm15, %v715_v62, 2147483647 }
0x11fb   :  { %v734_v3 = vshra.s32 %v732_v0, 16 }
0x11fd   :  { %v736_v4 = vcvt.s32.f32 %v734_v3 }
0x1229   :  { %v656_v15 = vpop.permute.xlu2 %655 }
0x122a   :  { %658 = vst.msk [vmem:[#allocation3 + $0x7] sm:$0x1] %vm173_vm8, %v656_v15  ;;  %vm765_vm8 = vcmask 130112  }
0x122b   :  { %659 = vst.msk [vmem:[#allocation3] sm:$0x1] %vm175_vm9, %v656_v15  ;;  %vm769_vm9 = vcmask 195712  }
0x1232   :  { %v660_v17 = vld [vmem:[#allocation3] sm:$0xff] }
0x1233   :  { %1710 = vmatmul.msk.f32.vlgmr.msra.gmra.mxu2 %vm102_vm1, %v660_v17  ;;  %vm711_vm1 = vcmp.eq.f32.partialorder %v697_v8, %v703_v28  ;;  %v733_v17 = vand.u32 65535, %v732_v0 }
0x1234   :  { %v714_v36 = vsel %vm711_vm1, %v1926_v16, 23 }
0x1235   :  { %v717_v37 = vsel %vm700_vm15, %v714_v36, 2147483647 }
0x1236   :  { %v719_v38 = vshra.s32 %v717_v37, 16  ;;  %v718_v57 = vand.u32 65535, %v717_v37 }
0x1238   :  { %v721_v39 = vcvt.s32.f32 %v719_v38  ;;  %v720_v59 = vcvt.s32.f32 %v718_v57 }
0x126b   :  { %v2083_v27 = vpop.xlane.xlu2 %709 }
0x126c   :  { %vm713_vm5 = vcmp.eq.f32.partialorder %v2038_v7, %v2083_v27 }
0x12b6   :  { %v689_v20 = vpop.f32.mrf.mxu2 }
0x12b7   :  { %v2064_v21 = vadd.f32 %v1749_v18, %v689_v20  ;;  %v735_v20 = vcvt.s32.f32 %v733_v17 }
0x12b9   :  { %v774_v22 = vperm.slane %v2064_v21, 0  ;;  %v899_v23 = vperm.slane %v2064_v21, 1  ;;  %v2072_v24 = vperm.slane %v2064_v21, 2  ;;  %v2077_v25 = vperm.slane %v2064_v21, 3 }
0x12ba   :  { %v1256_v56 = vperm.slane %v2064_v21, 4 }
0x12bb   :  { %791 = vperm.xlu1 %1717, %v774_v22   ;;  %785 = vperm.xlu0 %1716, %v774_v22  }
0x12bc   :  { %779 = vperm.xlu2 %1715, %v774_v22  }
0x12c3   :  { %1718 = vset.pattern.permute.xlu1 %v2035_v6  ;;  %1720 = vset.pattern.permute.xlu0 %v2046_v10 }
0x12c4   :  { %1719 = vset.pattern.permute.xlu2 %v2049_v11 }
0x12cb   :  { %904 = vperm.xlu1 %1718, %v899_v23   ;;  %916 = vperm.xlu0 %1720, %v899_v23  }
0x12cc   :  { %910 = vperm.xlu2 %1719, %v899_v23   ;;  %v2135_v23 = vperm.slane %v2064_v21, 5 }
0x12d3   :  { %1035 = vperm.xlu0 %1720, %v2072_v24   ;;  %1723 = vset.pattern.permute.xlu1 %v1821_v26 }
0x12d4   :  { %1721 = vset.pattern.permute.xlu2 %v2035_v6 }
0x12db   :  { %1154 = vperm.xlu0 %1720, %v2077_v25  }
0x12dc   :  { %1023 = vperm.xlu2 %1721, %v2072_v24  }
0x12e4   :  { %1722 = vset.pattern.permute.xlu2 %v1821_v26 }
0x1316   :  { %v780_v29 = vpop.permute.xlu2 %779 }
0x1317   :  { %v796_v30 = vadd.f32 %v780_v29, %v703_v28 }
0x1319   :  { %803 = vperm.xlu2 %1722, %v796_v30  }
0x1326   :  { %v911_v40 = vpop.permute.xlu2 %910 }
0x132d   :  { %v792_v32 = vpop.permute.xlu1 %791  ;;  %v786_v33 = vpop.permute.xlu0 %785 }
0x132e   :  { %v798_v34 = vadd.f32 %v792_v32, %v2083_v27  ;;  %v797_v35 = vadd.f32 %v786_v33, %v706_v31 }
0x1330   :  { %806 = vperm.xlu1 %1723, %v797_v35   ;;  %809 = vperm.xlu2 %1722, %v798_v34  }
0x1336   :  { %v2091_v41 = vpop.permute.xlu2 %1023 }
0x1338   :  { %1724 = vset.pattern.permute.xlu2 %v2035_v6 }
0x133d   :  { %v905_v43 = vpop.permute.xlu1 %904  ;;  %v917_v28 = vpop.permute.xlu0 %916 }
0x1340   :  { %1142 = vperm.xlu2 %1724, %v2077_v25  }
0x1345   :  { %v1036_v29 = vpop.permute.xlu0 %1035 }
0x1348   :  { %1725 = vset.pattern.permute.xlu2 %v1821_v26 }
0x134d   :  { %v2141_v30 = vpop.permute.xlu0 %1154 }
0x135a   :  { %722 = vmin.xlane.f32.xlu1 %v721_v39 }
0x1373   :  { %v804_v42 = vpop.permute.xlu2 %803 }
0x1374   :  { %v811_v48 = vperm.slane %v804_v42, %v1926_v16 }
0x138a   :  { %v810_v46 = vpop.permute.xlu2 %809 }
0x138b   :  { %v814_v19 = vperm.slane %v810_v46, %v2097_v45 }
0x139a   :  { %v2128_v9 = vpop.permute.xlu2 %1142 }
0x13a2   :  { %v807_v47 = vpop.permute.xlu1 %806 }
0x13a3   :  { %v812_v49 = vperm.slane %v807_v47, %v2094_v44 }
0x13a5   :  { %v813_v50 = vsel %vm765_vm8, %v812_v49, %v811_v48 }
0x13a6   :  { %v815_v51 = vsel %vm769_vm9, %v814_v19, %v813_v50 }
0x13a7   :  { %v2105_v52 = vadd.f32 %v815_v51, %v2021_v1  ;;  %v2108_v53 = vadd.f32 %v815_v51, %v2027_v2  ;;  %v2118_v61 = vadd.f32 %v815_v51, %v2032_v5 }
0x13a9   :  { %v839_v54 = vsel %vm707_vm14, %v2105_v52, -inf  ;;  %v833_v55 = vsel %vm700_vm15, %v2108_v53, -inf  ;;  %v836_v63 = vsel %vm700_vm15, %v2118_v61, -inf }
0x13aa   :  { %840 = vmax.xlane.f32.xlu0 %v839_v54  ;;  %834 = vmax.xlane.f32.xlu1 %v833_v55 }
0x13be   :  { %1273 = vperm.xlu0 %1720, %v1256_v56  }
0x13c6   :  { %1730 = vset.pattern.permute.xlu0 %v1821_v26 }
0x13cd   :  { %v723_v58 = vpop.xlane.xlu1 %722 }
0x13ce   :  { %vm724_vm0 = vcmp.eq.f32.partialorder %v721_v39, %v723_v58  ;;  %v729_v34 = vcvt.f32.s32 %v723_v58 }
0x13cf   :  { %v725_v60 = vsel %vm724_vm0, %v720_v59, inf }
0x13d0   :  { %726 = vmin.xlane.f32.xlu2 %v725_v60 }
0x13d8   :  { %837 = vmax.xlane.f32.xlu2 %v836_v63 }
0x13e0   :  { %737 = vmin.xlane.f32.xlu2 %v736_v4 }
0x141d   :  { %v2124_v8 = vpop.xlane.xlu1 %834  ;;  %v2144_v31 = vpop.xlane.xlu0 %840 }
0x141e   :  { %v921_v13 = vadd.f32 %v905_v43, %v2124_v8  ;;  %v923_v32 = vadd.f32 %v917_v28, %v2144_v31  ;;  %vm842_vm10 = vcmp.eq.f32.partialorder %v2108_v53, %v2124_v8  ;;  %vm844_vm3 = vcmp.eq.f32.partialorder %v2105_v52, %v2144_v31 }
0x1420   :  { %928 = vperm.xlu1 %1723, %v921_v13  }
0x1428   :  { %1727 = vset.pattern.permute.xlu1 %v2049_v11 }
0x1430   :  { %v2179_v13 = vpop.permute.xlu0 %1273 }
0x1443   :  { %v727_v12 = vpop.xlane.xlu2 %726 }
0x1444   :  { %v728_v35 = vcvt.f32.s32 %v727_v12 }
0x144b   :  { %v2130_v14 = vpop.xlane.xlu2 %837 }
0x144c   :  { %v922_v15 = vadd.f32 %v911_v40, %v2130_v14  ;;  %vm843_vm11 = vcmp.eq.f32.partialorder %v2118_v61, %v2130_v14  ;;  %v847_v14 = vsel %vm844_vm3, %v1926_v16, 23 }
0x144e   :  { %931 = vperm.xlu2 %1725, %v922_v15  }
0x1453   :  { %v738_v18 = vpop.xlane.xlu2 %737 }
0x1454   :  { %vm739_vm4 = vcmp.eq.f32.partialorder %v736_v4, %v738_v18  ;;  %v744_v36 = vcvt.f32.s32 %v738_v18 }
0x1455   :  { %v740_v22 = vsel %vm739_vm4, %v735_v20, inf }
0x1456   :  { %1726 = vset.pattern.permute.xlu2 %v2035_v6  ;;  %741 = vmin.xlane.f32.xlu1 %v740_v22  ;;  %v745_v38 = vshll.u32 %v744_v36, 16 }
0x145e   :  { %1261 = vperm.xlu2 %1726, %v1256_v56  }
0x1466   :  { %1380 = vperm.xlu2 %1726, %v2135_v23  }
0x146e   :  { %1729 = vset.pattern.permute.xlu2 %v1821_v26 }
0x146f   :  { %1029 = vperm.xlu1 %1727, %v2072_v24   ;;  %v730_v24 = vshll.u32 %v729_v34, 16 }
0x1477   :  { %1148 = vperm.xlu1 %1727, %v2077_v25   ;;  %v731_v25 = vadd.s32 %v730_v24, %v728_v35 }
0x1479   :  { %v762_v42 = vperm.slane %v731_v25, %v1926_v16 }
0x147f   :  { %1267 = vperm.xlu1 %1727, %v1256_v56  }
0x1487   :  { %1386 = vperm.xlu1 %1727, %v2135_v23  }
0x148f   :  { %1728 = vset.pattern.permute.xlu1 %v1821_v26 }
0x1490   :  { %934 = vperm.xlu1 %1728, %v923_v32  }
0x1492   :  { %v929_v33 = vpop.permute.xlu1 %928 }
0x1493   :  { %v936_v54 = vperm.slane %v929_v33, %v1926_v16 }
0x14a8   :  { %v932_v50 = vpop.permute.xlu2 %931 }
0x14a9   :  { %v937_v51 = vperm.slane %v932_v50, %v2094_v44 }
0x14ab   :  { %v938_v57 = vsel %vm765_vm8, %v937_v51, %v936_v54 }
0x14b8   :  { %v2177_v4 = vpop.permute.xlu2 %1261 }
0x14c0   :  { %v2181_v12 = vpop.permute.xlu2 %1380 }
0x14c9   :  { %v742_v37 = vpop.xlane.xlu1 %741 }
0x14ca   :  { %v743_v39 = vcvt.f32.s32 %v742_v37  ;;  %v716_v37 = vsel %vm713_vm5, %v1926_v16, 23 }
0x14cc   :  { %v746_v40 = vadd.s32 %v745_v38, %v743_v39 }
0x14ce   :  { %v764_v43 = vperm.slane %v746_v40, %v2094_v44 }
0x14d0   :  { %v2151_v46 = vsel %vm765_vm8, %v764_v43, %v762_v42  ;;  %v747_v42 = vsel %vm707_vm14, %v716_v37, 2147483647 }
0x14d1   :  { %v749_v43 = vshra.s32 %v747_v42, 16 }
0x14e1   :  { %v1030_v47 = vpop.permute.xlu1 %1029 }
0x14e9   :  { %v1149_v48 = vpop.permute.xlu1 %1148 }
0x14f1   :  { %v2153_v49 = vpop.permute.xlu1 %1267 }
0x14f9   :  { %v2155_v19 = vpop.permute.xlu1 %1386 }
0x1502   :  { %v935_v55 = vpop.permute.xlu1 %934 }
0x1503   :  { %v939_v56 = vperm.slane %v935_v55, %v2097_v45 }
0x1505   :  { %v940_v58 = vsel %vm769_vm9, %v939_v56, %v938_v57  ;;  %v748_v56 = vand.u32 65535, %v747_v42 }
0x1506   :  { %v2163_v59 = vadd.f32 %v940_v58, %v2021_v1  ;;  %v2166_v60 = vadd.f32 %v940_v58, %v2032_v5  ;;  %v2169_v62 = vadd.f32 %v940_v58, %v2027_v2 }
0x1508   :  { %v958_v63 = vsel %vm707_vm14, %v2163_v59, -inf  ;;  %v955_v0 = vsel %vm700_vm15, %v2166_v60, -inf  ;;  %v952_v3 = vsel %vm700_vm15, %v2169_v62, -inf }
0x1509   :  { %959 = vmax.xlane.f32.xlu0 %v958_v63  ;;  %956 = vmax.xlane.f32.xlu1 %v955_v0  ;;  %v750_v63 = vcvt.s32.f32 %v748_v56 }
0x150a   :  { %953 = vmax.xlane.f32.xlu2 %v952_v3 }
0x157c   :  { %v2183_v15 = vpop.xlane.xlu0 %959  ;;  %v2185_v17 = vpop.xlane.xlu1 %956 }
0x157d   :  { %v1042_v18 = vadd.f32 %v1036_v29, %v2183_v15  ;;  %v1041_v20 = vadd.f32 %v1030_v47, %v2185_v17  ;;  %v2189_v22 = vpop.xlane.xlu2 %953  ;;  %v751_v47 = vcvt.s32.f32 %v749_v43  ;;  %vm962_vm0 = vcmp.eq.f32.partialorder %v2166_v60, %v2185_v17 }
0x157e   :  { %v1040_v28 = vadd.f32 %v2091_v41, %v2189_v22  ;;  %vm961_vm13 = vcmp.eq.f32.partialorder %v2169_v62, %v2189_v22  ;;  %vm963_vm4 = vcmp.eq.f32.partialorder %v2163_v59, %v2183_v15 }
0x157f   :  { %1053 = vperm.xlu0 %1730, %v1042_v18   ;;  %1050 = vperm.xlu1 %1728, %v1041_v20  }
0x1580   :  { %1047 = vperm.xlu2 %1729, %v1040_v28  }
0x1587   :  { %1731 = vset.pattern.permute.xlu0 %v2046_v10 }
0x15da   :  { %v1048_v32 = vpop.permute.xlu2 %1047 }
0x15db   :  { %v1055_v35 = vperm.slane %v1048_v32, %v1926_v16 }
0x15f1   :  { %v1054_v33 = vpop.permute.xlu0 %1053  ;;  %v1051_v34 = vpop.permute.xlu1 %1050 }
0x15f2   :  { %v1058_v36 = vperm.slane %v1054_v33, %v2097_v45  ;;  %v1056_v29 = vperm.slane %v1051_v34, %v2094_v44 }
0x15f4   :  { %v1057_v24 = vsel %vm765_vm8, %v1056_v29, %v1055_v35 }
0x15f5   :  { %v1059_v41 = vsel %vm769_vm9, %v1058_v36, %v1057_v24 }
0x15f6   :  { %v2203_v25 = vadd.f32 %v1059_v41, %v2021_v1  ;;  %v2206_v38 = vadd.f32 %v1059_v41, %v2032_v5  ;;  %v2209_v39 = vadd.f32 %v1059_v41, %v2027_v2 }
0x15f8   :  { %v1077_v40 = vsel %vm707_vm14, %v2203_v25, -inf  ;;  %v1074_v7 = vsel %vm700_vm15, %v2206_v38, -inf  ;;  %v1071_v27 = vsel %vm700_vm15, %v2209_v39, -inf }
0x15f9   :  { %1078 = vmax.xlane.f32.xlu0 %v1077_v40  ;;  %1075 = vmax.xlane.f32.xlu1 %v1074_v7 }
0x15fa   :  { %1072 = vmax.xlane.f32.xlu2 %v1071_v27 }
0x1602   :  { %752 = vmin.xlane.f32.xlu2 %v751_v47 }
0x160d   :  { %1392 = vperm.xlu0 %1731, %v2135_v23  }
0x1615   :  { %1733 = vset.pattern.permute.xlu0 %v1821_v26 }
0x166c   :  { %v2220_v50 = vpop.xlane.xlu1 %1075  ;;  %v2227_v57 = vpop.xlane.xlu0 %1078 }
0x166d   :  { %v1160_v51 = vadd.f32 %v1149_v48, %v2220_v50  ;;  %v2223_v54 = vpop.xlane.xlu2 %1072  ;;  %v1161_v23 = vadd.f32 %v2141_v30, %v2227_v57 }
0x166e   :  { %v1159_v55 = vadd.f32 %v2128_v9, %v2223_v54 }
0x166f   :  { %1169 = vperm.xlu1 %1728, %v1160_v51   ;;  %v1494_v51 = vperm.slane %v2064_v21, 6 }
0x1670   :  { %1166 = vperm.xlu2 %1729, %v1159_v55   ;;  %v845_v55 = vsel %vm842_vm10, %v1926_v16, 23 }
0x1675   :  { %v753_v58 = vpop.xlane.xlu2 %752 }
0x1676   :  { %vm754_vm6 = vcmp.eq.f32.partialorder %v751_v47, %v753_v58  ;;  %v759_v29 = vcvt.f32.s32 %v753_v58  ;;  %v846_v58 = vsel %vm843_vm11, %v1926_v16, 23 }
0x1677   :  { %v755_v0 = vsel %vm754_vm6, %v750_v63, inf  ;;  %1735 = vset.pattern.permute.xlu1 %v2046_v10  ;;  %vm1080_vm6 = vcmp.eq.f32.partialorder %v2209_v39, %v2223_v54 }
0x1678   :  { %1172 = vperm.xlu2 %1729, %v1161_v23   ;;  %756 = vmin.xlane.f32.xlu0 %v755_v0  ;;  %v760_v7 = vshll.u32 %v759_v29, 16  ;;  %v863_v23 = vsel %vm700_vm15, %v846_v58, 2147483647 }
0x1679   :  { %v865_v0 = vshra.s32 %v863_v23, 16 }
0x167f   :  { %v2235_v28 = vpop.permute.xlu0 %1392 }
0x1680   :  { %1732 = vset.pattern.permute.xlu2 %v2035_v6 }
0x16ca   :  { %v1167_v48 = vpop.permute.xlu2 %1166 }
0x16cb   :  { %v1174_v18 = vperm.slane %v1167_v48, %v1926_v16  ;;  %v867_v48 = vcvt.s32.f32 %v865_v0 }
0x16d2   :  { %v1173_v9 = vpop.permute.xlu2 %1172 }
0x16d3   :  { %v1177_v32 = vperm.slane %v1173_v9, %v2097_v45 }
0x16e1   :  { %v1170_v3 = vpop.permute.xlu1 %1169 }
0x16e2   :  { %v1175_v20 = vperm.slane %v1170_v3, %v2094_v44 }
0x16e4   :  { %v1176_v30 = vsel %vm765_vm8, %v1175_v20, %v1174_v18 }
0x16e5   :  { %v1178_v33 = vsel %vm769_vm9, %v1177_v32, %v1176_v30  ;;  %v864_v32 = vand.u32 65535, %v863_v23 }
0x16e6   :  { %v2241_v34 = vadd.f32 %v1178_v33, %v2021_v1  ;;  %v2244_v35 = vadd.f32 %v1178_v33, %v2032_v5  ;;  %v2247_v36 = vadd.f32 %v1178_v33, %v2027_v2  ;;  %v964_v33 = vsel %vm961_vm13, %v1926_v16, 23 }
0x16e8   :  { %v1196_v24 = vsel %vm707_vm14, %v2241_v34, -inf  ;;  %v1193_v41 = vsel %vm700_vm15, %v2244_v35, -inf  ;;  %v1190_v37 = vsel %vm700_vm15, %v2247_v36, -inf }
0x16e9   :  { %1197 = vmax.xlane.f32.xlu1 %v1196_v24  ;;  %1194 = vmax.xlane.f32.xlu2 %v1193_v41  ;;  %v866_v24 = vcvt.s32.f32 %v864_v32  ;;  %v967_v41 = vsel %vm700_vm15, %v964_v33, 2147483647 }
0x16ea   :  { %1191 = vmax.xlane.f32.xlu0 %v1190_v37  ;;  %v969_v37 = vshra.s32 %v967_v41, 16  ;;  %v968_v23 = vand.u32 65535, %v967_v41 }
0x16eb   :  { %v757_v40 = vpop.xlane.xlu0 %756 }
0x16ec   :  { %v758_v27 = vcvt.f32.s32 %v757_v40  ;;  %v971_v40 = vcvt.s32.f32 %v969_v37  ;;  %v970_v60 = vcvt.s32.f32 %v968_v23 }
0x16ee   :  { %v761_v42 = vadd.s32 %v760_v7, %v758_v27 }
0x16f0   :  { %v768_v43 = vperm.slane %v761_v42, %v2097_v45 }
0x16f2   :  { %v770_v47 = vsel %vm769_vm9, %v768_v43, %v2151_v46  ;;  %v848_v46 = vsel %vm700_vm15, %v845_v55, 2147483647  ;;  %v965_v55 = vsel %vm962_vm0, %v1926_v16, 23  ;;  %vm1082_vm0 = vcmp.eq.f32.partialorder %v2203_v25, %v2227_v57 }
0x16f3   :  { %772 = vst.msk [vmem:[%s2660_s10] sm:$0x1] %vm771_vm7, %v770_v47  ;;  %v850_v56 = vshra.s32 %v848_v46, 16  ;;  %v849_v8 = vand.u32 65535, %v848_v46 }
0x16f5   :  { %v852_v63 = vcvt.s32.f32 %v850_v56  ;;  %v851_v18 = vcvt.s32.f32 %v849_v8 }
0x1701   :  { %1499 = vperm.xlu2 %1732, %v1494_v51  }
0x1702   :  { %1511 = vperm.xlu1 %1735, %v1494_v51  }
0x1709   :  { %1739 = vset.pattern.permute.xlu2 %v2049_v11 }
0x170a   :  { %1736 = vset.pattern.permute.xlu1 %v1821_v26 }
0x172a   :  { %853 = vmin.xlane.f32.xlu2 %v852_v63 }
0x1732   :  { %868 = vmin.xlane.f32.xlu2 %v867_v48 }
0x175c   :  { %v2273_v9 = vpop.xlane.xlu2 %1194  ;;  %v2289_v7 = vpop.xlane.xlu1 %1197 }
0x175d   :  { %v1279_v53 = vadd.f32 %v2153_v49, %v2273_v9  ;;  %v878_v49 = vsel %vm707_vm14, %v847_v14, 2147483647  ;;  %vm1200_vm13 = vcmp.eq.f32.partialorder %v2244_v35, %v2273_v9  ;;  %v1085_v9 = vsel %vm1082_vm0, %v1926_v16, 23 }
0x175e   :  { %v880_v30 = vshra.s32 %v878_v49, 16 }
0x175f   :  { %1288 = vperm.xlu0 %1733, %v1279_v53  }
0x1760   :  { %v882_v52 = vcvt.s32.f32 %v880_v30 }
0x1764   :  { %v2279_v61 = vpop.permute.xlu2 %1499 }
0x1767   :  { %1734 = vset.pattern.permute.xlu0 %v2049_v11 }
0x176f   :  { %1505 = vperm.xlu0 %1734, %v1494_v51   ;;  %v879_v51 = vand.u32 65535, %v878_v49 }
0x1771   :  { %v881_v56 = vcvt.s32.f32 %v879_v51  ;;  %v1083_v51 = vsel %vm1080_vm6, %v1926_v16, 23 }
0x1772   :  { %v1086_v54 = vsel %vm700_vm15, %v1083_v51, 2147483647 }
0x1774   :  { %v2291_v27 = vpop.permute.xlu1 %1511 }
0x1777   :  { %1737 = vset.pattern.permute.xlu0 %v1821_v26 }
0x179d   :  { %v854_v3 = vpop.xlane.xlu2 %853 }
0x179e   :  { %vm855_vm12 = vcmp.eq.f32.partialorder %v852_v63, %v854_v3  ;;  %v860_v62 = vcvt.f32.s32 %v854_v3  ;;  %v982_v63 = vsel %vm700_vm15, %v965_v55, 2147483647 }
0x179f   :  { %v856_v20 = vsel %vm855_vm12, %v851_v18, inf  ;;  %v984_v0 = vshra.s32 %v982_v63, 16  ;;  %vm1081_vm12 = vcmp.eq.f32.partialorder %v2206_v38, %v2220_v50 }
0x17a0   :  { %857 = vmin.xlane.f32.xlu1 %v856_v20  ;;  %v861_v42 = vshll.u32 %v860_v62, 16  ;;  %v1192_v20 = vpop.xlane.xlu0 %1191 }
0x17a1   :  { %v986_v17 = vcvt.s32.f32 %v984_v0  ;;  %vm1199_vm3 = vcmp.eq.f32.partialorder %v2247_v36, %v1192_v20 }
0x17a5   :  { %v869_v29 = vpop.xlane.xlu2 %868 }
0x17a6   :  { %vm870_vm1 = vcmp.eq.f32.partialorder %v867_v48, %v869_v29  ;;  %v966_v48 = vsel %vm963_vm4, %v1926_v16, 23  ;;  %v875_v15 = vcvt.f32.s32 %v869_v29  ;;  %v983_v29 = vand.u32 65535, %v982_v63 }
0x17a7   :  { %v871_v31 = vsel %vm870_vm1, %v866_v24, inf  ;;  %v997_v14 = vsel %vm707_vm14, %v966_v48, 2147483647  ;;  %v1088_v63 = vshra.s32 %v1086_v54, 16 }
0x17a8   :  { %883 = vmin.xlane.f32.xlu1 %v882_v52  ;;  %872 = vmin.xlane.f32.xlu2 %v871_v31  ;;  %v999_v3 = vshra.s32 %v997_v14, 16  ;;  %v876_v30 = vshll.u32 %v875_v15, 16 }
0x17a9   :  { %v1090_v48 = vcvt.s32.f32 %v1088_v63 }
0x17aa   :  { %v1001_v18 = vcvt.s32.f32 %v999_v3  ;;  %v1280_v3 = vadd.f32 %v2179_v13, %v2289_v7 }
0x17b0   :  { %972 = vmin.xlane.f32.xlu1 %v971_v40 }
0x17d1   :  { %v2304_v49 = vpop.permute.xlu0 %1288 }
0x1813   :  { %v858_v22 = vpop.xlane.xlu1 %857 }
0x1814   :  { %v859_v43 = vcvt.f32.s32 %v858_v22 }
0x1816   :  { %v862_v47 = vadd.s32 %v861_v42, %v859_v43 }
0x1818   :  { %v893_v22 = vperm.slane %v862_v47, %v1926_v16  ;;  %v998_v47 = vand.u32 65535, %v997_v14 }
0x181a   :  { %v1000_v0 = vcvt.s32.f32 %v998_v47 }
0x181b   :  { %v884_v46 = vpop.xlane.xlu1 %883  ;;  %v873_v59 = vpop.xlane.xlu2 %872 }
0x181c   :  { %vm885_vm2 = vcmp.eq.f32.partialorder %v882_v52, %v884_v46  ;;  %v874_v32 = vcvt.f32.s32 %v873_v59  ;;  %v890_v33 = vcvt.f32.s32 %v884_v46  ;;  %v2306_v52 = vpop.permute.xlu0 %1505 }
0x181d   :  { %v886_v58 = vsel %vm885_vm2, %v881_v56, inf }
0x181e   :  { %887 = vmin.xlane.f32.xlu2 %v886_v58  ;;  %v877_v24 = vadd.s32 %v876_v30, %v874_v32  ;;  %v891_v41 = vshll.u32 %v890_v33, 16  ;;  %v985_v58 = vcvt.s32.f32 %v983_v29 }
0x1823   :  { %v2300_v53 = vpop.xlane.xlu1 %972 }
0x1824   :  { %vm974_vm5 = vcmp.eq.f32.partialorder %v971_v40, %v2300_v53  ;;  %v894_v40 = vperm.slane %v877_v24, %v2094_v44  ;;  %v979_v32 = vcvt.f32.s32 %v2300_v53 }
0x1825   :  { %v975_v8 = vsel %vm974_vm5, %v970_v60, inf }
0x1826   :  { %987 = vmin.xlane.f32.xlu2 %v986_v17  ;;  %976 = vmin.xlane.f32.xlu0 %v975_v8  ;;  %v895_v43 = vsel %vm765_vm8, %v894_v40, %v893_v22  ;;  %v1278_v8 = vadd.f32 %v2177_v4, %v1192_v20  ;;  %v980_v36 = vshll.u32 %v979_v32, 16 }
0x182e   :  { %1002 = vmin.xlane.f32.xlu0 %v1001_v18 }
0x1891   :  { %v888_v31 = vpop.xlane.xlu2 %887 }
0x1892   :  { %v889_v37 = vcvt.f32.s32 %v888_v31 }
0x1894   :  { %v892_v62 = vadd.s32 %v891_v41, %v889_v37 }
0x1896   :  { %v896_v42 = vperm.slane %v892_v62, %v2097_v45 }
0x1898   :  { %v897_v55 = vsel %vm769_vm9, %v896_v42, %v895_v43 }
0x1899   :  { %898 = vst.msk [vmem:[%s2660_s10 + $0x1] sm:$0x1] %vm771_vm7, %v897_v55  ;;  %v988_v46 = vpop.xlane.xlu2 %987  ;;  %v977_v56 = vpop.xlane.xlu0 %976 }
0x189a   :  { %vm989_vm10 = vcmp.eq.f32.partialorder %v986_v17, %v988_v46  ;;  %v1202_v17 = vsel %vm1199_vm3, %v1926_v16, 23  ;;  %v994_v15 = vcvt.f32.s32 %v988_v46  ;;  %v978_v33 = vcvt.f32.s32 %v977_v56 }
0x189b   :  { %v990_v39 = vsel %vm989_vm10, %v985_v58, inf  ;;  %v2327_v14 = vsel %vm700_vm15, %v1202_v17, 2147483647  ;;  %v1294_v56 = vperm.slane %v2304_v49, %v2094_v44  ;;  %v1087_v49 = vand.u32 65535, %v1086_v54 }
0x189c   :  { %991 = vmin.xlane.f32.xlu1 %v990_v39  ;;  %v1207_v59 = vshra.s32 %v2327_v14, 16  ;;  %v995_v13 = vshll.u32 %v994_v15, 16  ;;  %v981_v31 = vadd.s32 %v980_v36, %v978_v33  ;;  %v1084_v17 = vsel %vm1081_vm12, %v1926_v16, 23 }
0x189d   :  { %v1089_v15 = vcvt.s32.f32 %v1087_v49  ;;  %v1101_v38 = vsel %vm700_vm15, %v1084_v17, 2147483647  ;;  %vm1201_vm3 = vcmp.eq.f32.partialorder %v2241_v34, %v2289_v7 }
0x189e   :  { %v1012_v29 = vperm.slane %v981_v31, %v1926_v16  ;;  %v1103_v35 = vshra.s32 %v1101_v38, 16 }
0x18a1   :  { %v1003_v23 = vpop.xlane.xlu0 %1002 }
0x18a2   :  { %vm1004_vm11 = vcmp.eq.f32.partialorder %v1001_v18, %v1003_v23  ;;  %v2330_v18 = vcvt.s32.f32 %v1207_v59  ;;  %v1009_v24 = vcvt.f32.s32 %v1003_v23  ;;  %v1203_v59 = vsel %vm1200_vm13, %v1926_v16, 23 }
0x18a3   :  { %v1005_v60 = vsel %vm1004_vm11, %v1000_v0, inf }
0x18a4   :  { %1091 = vmin.xlane.f32.xlu1 %v1090_v48  ;;  %1006 = vmin.xlane.f32.xlu2 %v1005_v60  ;;  %v1010_v37 = vshll.u32 %v1009_v24, 16 }
0x18bd   :  { %1285 = vperm.xlu1 %1736, %v1278_v8  }
0x18c5   :  { %1291 = vperm.xlu1 %1736, %v1280_v3  }
0x18ef   :  { %1210 = vmin.xlane.f32.xlu1 %v2330_v18 }
0x190f   :  { %v992_v4 = vpop.xlane.xlu1 %991 }
0x1910   :  { %v993_v30 = vcvt.f32.s32 %v992_v4 }
0x1912   :  { %v996_v20 = vadd.s32 %v995_v13, %v993_v30  ;;  %v2365_v30 = vsel %vm700_vm15, %v1203_v59, 2147483647  ;;  %v2375_v13 = vsel %vm707_vm14, %v1085_v9, 2147483647 }
0x1913   :  { %v1222_v50 = vshra.s32 %v2365_v30, 16  ;;  %v1118_v33 = vshra.s32 %v2375_v13, 16 }
0x1914   :  { %v1013_v62 = vperm.slane %v996_v20, %v2094_v44 }
0x1915   :  { %v2372_v54 = vcvt.s32.f32 %v1222_v50  ;;  %v2379_v24 = vcvt.s32.f32 %v1118_v33 }
0x1916   :  { %v1014_v43 = vsel %vm765_vm8, %v1013_v62, %v1012_v29 }
0x1917   :  { %v1007_v41 = vpop.xlane.xlu2 %1006  ;;  %v1092_v51 = vpop.xlane.xlu1 %1091 }
0x1918   :  { %v1008_v40 = vcvt.f32.s32 %v1007_v41  ;;  %vm1093_vm1 = vcmp.eq.f32.partialorder %v1090_v48, %v1092_v51  ;;  %v1105_v48 = vcvt.s32.f32 %v1103_v35 }
0x1919   :  { %v1094_v4 = vsel %vm1093_vm1, %v1089_v15, inf }
0x191a   :  { %v1011_v22 = vadd.s32 %v1010_v37, %v1008_v40  ;;  %v1098_v37 = vcvt.f32.s32 %v1092_v51 }
0x191c   :  { %v1015_v42 = vperm.slane %v1011_v22, %v2097_v45  ;;  %v1099_v29 = vshll.u32 %v1098_v37, 16 }
0x191e   :  { %v1016_v53 = vsel %vm769_vm9, %v1015_v42, %v1014_v43 }
0x191f   :  { %1017 = vst.msk [vmem:[%s2660_s10 + $0x2] sm:$0x1] %vm771_vm7, %v1016_v53 }
0x192f   :  { %v1286_v55 = vpop.permute.xlu1 %1285 }
0x1930   :  { %v1293_v46 = vperm.slane %v1286_v55, %v1926_v16 }
0x1932   :  { %v1295_v47 = vsel %vm765_vm8, %v1294_v56, %v1293_v46  ;;  %v1102_v46 = vand.u32 65535, %v1101_v38 }
0x1937   :  { %v1292_v58 = vpop.permute.xlu1 %1291 }
0x1938   :  { %v1296_v39 = vperm.slane %v1292_v58, %v2097_v45 }
0x193a   :  { %v1297_v63 = vsel %vm769_vm9, %v1296_v39, %v1295_v47 }
0x193b   :  { %v1306_v23 = vadd.f32 %v1297_v63, %v2027_v2  ;;  %v2351_v0 = vadd.f32 %v1297_v63, %v2032_v5  ;;  %v1308_v3 = vadd.f32 %v1297_v63, %v2021_v1 }
0x193d   :  { %v1309_v60 = vsel %vm700_vm15, %v1306_v23, -inf  ;;  %v1312_v8 = vsel %vm700_vm15, %v2351_v0, -inf  ;;  %v1315_v32 = vsel %vm707_vm14, %v1308_v3, -inf }
0x193e   :  { %1310 = vmax.xlane.f32.xlu0 %v1309_v60  ;;  %1313 = vmax.xlane.f32.xlu2 %v1312_v8 }
0x1946   :  { %1095 = vmin.xlane.f32.xlu0 %v1094_v4  ;;  %1316 = vmax.xlane.f32.xlu2 %v1315_v32 }
0x194e   :  { %1225 = vmin.xlane.f32.xlu0 %v2372_v54  ;;  %1106 = vmin.xlane.f32.xlu2 %v1105_v48 }
0x1956   :  { %1121 = vmin.xlane.f32.xlu2 %v2379_v24 }
0x1962   :  { %v2417_v49 = vpop.xlane.xlu1 %1210 }
0x1963   :  { %vm1212_vm13 = vcmp.eq.f32.partialorder %v2330_v18, %v2417_v49 }
0x19b1   :  { %v1314_v25 = vpop.xlane.xlu2 %1313  ;;  %v1311_v57 = vpop.xlane.xlu0 %1310 }
0x19b2   :  { %vm1318_vm2 = vcmp.eq.f32.partialorder %v1306_v23, %v1311_v57  ;;  %v1397_v36 = vadd.f32 %v2181_v12, %v1311_v57  ;;  %v1398_v42 = vadd.f32 %v2155_v19, %v1314_v25  ;;  %v1104_v19 = vcvt.s32.f32 %v1102_v46 }
0x19b3   :  { %v1321_v20 = vsel %vm1318_vm2, %v1926_v16, 23  ;;  %vm1319_vm6 = vcmp.eq.f32.partialorder %v2351_v0, %v1314_v25 }
0x19b4   :  { %1404 = vperm.xlu1 %1736, %v1397_v36   ;;  %v2385_v31 = vsel %vm700_vm15, %v1321_v20, 2147483647  ;;  %v1322_v63 = vsel %vm1319_vm6, %v1926_v16, 23 }
0x19b5   :  { %v1326_v41 = vshra.s32 %v2385_v31, 16  ;;  %v2411_v23 = vsel %vm700_vm15, %v1322_v63, 2147483647 }
0x19b6   :  { %v1341_v60 = vshra.s32 %v2411_v23, 16 }
0x19b7   :  { %v2388_v40 = vcvt.s32.f32 %v1326_v41 }
0x19b8   :  { %v2414_v8 = vcvt.s32.f32 %v1341_v60 }
0x19b9   :  { %v1317_v62 = vpop.xlane.xlu2 %1316  ;;  %1329 = vmin.xlane.f32.xlu2 %v2388_v40  ;;  %v1096_v22 = vpop.xlane.xlu0 %1095 }
0x19ba   :  { %vm1320_vm4 = vcmp.eq.f32.partialorder %v1308_v3, %v1317_v62  ;;  %v1097_v12 = vcvt.f32.s32 %v1096_v22  ;;  %v1399_v39 = vadd.f32 %v2235_v28, %v1317_v62 }
0x19bb   :  { %v1323_v43 = vsel %vm1320_vm4, %v1926_v16, 23 }
0x19bc   :  { %v2393_v53 = vadd.s32 %v1099_v29, %v1097_v12  ;;  %1407 = vperm.xlu1 %1736, %v1398_v42   ;;  %v2396_v55 = vsel %vm707_vm14, %v1323_v43, 2147483647 }
0x19bd   :  { %v1356_v51 = vshra.s32 %v2396_v55, 16 }
0x19bf   :  { %v2399_v56 = vcvt.s32.f32 %v1356_v51 }
0x19c1   :  { %1359 = vmin.xlane.f32.xlu0 %v2399_v56  ;;  %v2402_v58 = vpop.xlane.xlu2 %1106 }
0x19c2   :  { %vm1108_vm5 = vcmp.eq.f32.partialorder %v1105_v48, %v2402_v58 }
0x19c3   :  { %v2406_v47 = vsel %vm1108_vm5, %v1104_v19, inf }
0x19c4   :  { %1410 = vperm.xlu1 %1736, %v1399_v39  }
0x19c9   :  { %v2430_v25 = vpop.xlane.xlu2 %1121 }
0x19ee   :  { %1344 = vmin.xlane.f32.xlu1 %v2414_v8 }
0x1a26   :  { %v1405_v28 = vpop.permute.xlu1 %1404 }
0x1a27   :  { %v1412_v59 = vperm.slane %v1405_v28, %v1926_v16 }
0x1a2c   :  { %v2432_v57 = vpop.xlane.xlu2 %1329 }
0x1a2d   :  { %vm1331_vm6 = vcmp.eq.f32.partialorder %v2388_v40, %v2432_v57 }
0x1a2e   :  { %v1408_v3 = vpop.permute.xlu1 %1407 }
0x1a2f   :  { %v1413_v17 = vperm.slane %v1408_v3, %v2094_v44 }
0x1a31   :  { %v1414_v4 = vsel %vm765_vm8, %v1413_v17, %v1412_v59 }
0x1a36   :  { %v1411_v0 = vpop.permute.xlu1 %1410 }
0x1a37   :  { %v1415_v15 = vperm.slane %v1411_v0, %v2097_v45 }
0x1a39   :  { %v1416_v32 = vsel %vm769_vm9, %v1415_v15, %v1414_v4 }
0x1a3a   :  { %v1425_v38 = vadd.f32 %v1416_v32, %v2027_v2  ;;  %v1426_v50 = vadd.f32 %v1416_v32, %v2032_v5  ;;  %v1427_v48 = vadd.f32 %v1416_v32, %v2021_v1  ;;  %v1206_v32 = vand.u32 65535, %v2327_v14 }
0x1a3c   :  { %v1428_v35 = vsel %vm700_vm15, %v1425_v38, -inf  ;;  %v1431_v9 = vsel %vm700_vm15, %v1426_v50, -inf  ;;  %v1434_v33 = vsel %vm707_vm14, %v1427_v48, -inf  ;;  %v1208_v14 = vcvt.s32.f32 %v1206_v32 }
0x1a3d   :  { %1429 = vmax.xlane.f32.xlu1 %v1428_v35  ;;  %1432 = vmax.xlane.f32.xlu2 %v1431_v9  ;;  %v1816_v35 = vld [vmem:[%s2659_s8] sm:$0xff] }
0x1a45   :  { %1435 = vmax.xlane.f32.xlu2 %v1434_v33 }
0x1a61   :  { %v2434_v36 = vpop.xlane.xlu1 %1344 }
0x1a62   :  { %vm1346_vm2 = vcmp.eq.f32.partialorder %v2414_v8, %v2434_v36 }
0x1ab0   :  { %v1430_v2 = vpop.xlane.xlu1 %1429  ;;  %v1433_v20 = vpop.xlane.xlu2 %1432 }
0x1ab1   :  { %v1516_v5 = vadd.f32 %v2279_v61, %v1430_v2  ;;  %vm1438_vm10 = vcmp.eq.f32.partialorder %v1426_v50, %v1433_v20  ;;  %v1517_v29 = vadd.f32 %v2306_v52, %v1433_v20  ;;  %vm1437_vm12 = vcmp.eq.f32.partialorder %v1425_v38, %v1430_v2  ;;  %v1815_v38 = vld [vmem:[%s2659_s8 + $0x8] sm:$0xff]  ;;  %v1817_v20 = vld [vmem:[%s2659_s8 + $0x10] sm:$0x7f] }
0x1ab2   :  { %v1441_v41 = vsel %vm1438_vm10, %v1926_v16, 23  ;;  %v1204_v52 = vsel %vm1201_vm3, %v1926_v16, 23  ;;  %v1440_v46 = vsel %vm1437_vm12, %v1926_v16, 23  ;;  %v1213_v2 = vsel %vm1212_vm13, %v1208_v14, inf }
0x1ab3   :  { %1523 = vperm.xlu1 %1736, %v1516_v5   ;;  %v2439_v37 = vsel %vm700_vm15, %v1441_v41, 2147483647  ;;  %v2463_v19 = vsel %vm707_vm14, %v1204_v52, 2147483647  ;;  %v1443_v39 = vsel %vm700_vm15, %v1440_v46, 2147483647  ;;  %vm1123_vm10 = vcmp.eq.f32.partialorder %v2379_v24, %v2430_v25 }
0x1ab4   :  { %v1460_v1 = vshra.s32 %v2439_v37, 16  ;;  %v1237_v63 = vshra.s32 %v2463_v19, 16  ;;  %v1445_v60 = vshra.s32 %v1443_v39, 16  ;;  %v1355_v41 = vand.u32 65535, %v2396_v55 }
0x1ab6   :  { %v2442_v62 = vcvt.s32.f32 %v1460_v1  ;;  %v2468_v28 = vcvt.s32.f32 %v1237_v63  ;;  %v1447_v34 = vcvt.s32.f32 %v1445_v60  ;;  %v1357_v18 = vcvt.s32.f32 %v1355_v41 }
0x1ab8   :  { %1463 = vmin.xlane.f32.xlu2 %v2442_v62  ;;  %v1436_v22 = vpop.xlane.xlu2 %1435 }
0x1ab9   :  { %vm1439_vm11 = vcmp.eq.f32.partialorder %v1427_v48, %v1436_v22  ;;  %v1518_v42 = vadd.f32 %v2291_v27, %v1436_v22  ;;  %v1613_v27 = vperm.slane %v2064_v21, 7  ;;  %v1750_v21 = vld [vmem:[%s2661_s9] ss:$0 sm:$0xff] }
0x1aba   :  { %v1442_v61 = vsel %vm1439_vm11, %v1926_v16, 23 }
0x1abb   :  { %1526 = vperm.xlu1 %1736, %v1517_v29   ;;  %1529 = vperm.xlu0 %1737, %v1518_v42   ;;  %v2449_v12 = vsel %vm707_vm14, %v1442_v61, 2147483647  ;;  %v1444_v29 = vand.u32 65535, %v1443_v39 }
0x1abc   :  { %v1475_v43 = vshra.s32 %v2449_v12, 16 }
0x1abd   :  { %v1446_v61 = vcvt.s32.f32 %v1444_v29 }
0x1abe   :  { %v2452_v51 = vcvt.s32.f32 %v1475_v43  ;;  %v1221_v43 = vand.u32 65535, %v2365_v30 }
0x1ac0   :  { %1478 = vmin.xlane.f32.xlu2 %v2452_v51  ;;  %v1223_v46 = vcvt.s32.f32 %v1221_v43 }
0x1ac3   :  { %1740 = vset.pattern.permute.xlu1 %v2046_v10  ;;  %1738 = vset.pattern.permute.xlu0 %v2035_v6 }
0x1ad8   :  { %1624 = vperm.xlu2 %1739, %v1613_v27  }
0x1ae0   :  { %1741 = vset.pattern.permute.xlu2 %v2035_v6  ;;  %v2477_v6 = vpop.xlane.xlu0 %1225 }
0x1ae1   :  { %vm1227_vm4 = vcmp.eq.f32.partialorder %v2372_v54, %v2477_v6 }
0x1ae2   :  { %v1228_v63 = vsel %vm1227_vm4, %v1223_v46, inf }
0x1ae5   :  { %1240 = vmin.xlane.f32.xlu1 %v2468_v28  ;;  %1448 = vmin.xlane.f32.xlu0 %v1447_v34 }
0x1ae8   :  { %1645 = vperm.xlu2 %1741, %v1750_v21   ;;  %v2479_v7 = vpop.xlane.xlu0 %1359 }
0x1ae9   :  { %vm1361_vm1 = vcmp.eq.f32.partialorder %v2399_v56, %v2479_v7  ;;  %v1340_v56 = vand.u32 65535, %v2411_v23 }
0x1aea   :  { %v1362_v22 = vsel %vm1361_vm1, %v1357_v18, inf }
0x1af0   :  { %1743 = vset.pattern.permute.xlu2 %v2046_v10 }
0x1afe   :  { %1630 = vperm.xlu1 %1740, %v1613_v27  }
0x1b06   :  { %1742 = vset.pattern.permute.xlu1 %v2049_v11 }
0x1b0e   :  { %1651 = vperm.xlu1 %1742, %v1750_v21  }
0x1b16   :  { %1744 = vset.pattern.permute.xlu1 %v1821_v26 }
0x1b25   :  { %v1524_v3 = vpop.permute.xlu1 %1523 }
0x1b26   :  { %v1531_v0 = vperm.slane %v1524_v3, %v1926_v16 }
0x1b2b   :  { %v2533_v8 = vpop.xlane.xlu2 %1463 }
0x1b2c   :  { %vm1465_vm11 = vcmp.eq.f32.partialorder %v2442_v62, %v2533_v8 }
0x1b2d   :  { %v1527_v17 = vpop.permute.xlu1 %1526  ;;  %v1530_v59 = vpop.permute.xlu0 %1529 }
0x1b2e   :  { %v1532_v15 = vperm.slane %v1527_v17, %v2094_v44  ;;  %v1534_v4 = vperm.slane %v1530_v59, %v2097_v45  ;;  %v1474_v17 = vand.u32 65535, %v2449_v12 }
0x1b30   :  { %v1533_v10 = vsel %vm765_vm8, %v1532_v15, %v1531_v0 }
0x1b31   :  { %v1535_v11 = vsel %vm769_vm9, %v1534_v4, %v1533_v10 }
0x1b32   :  { %v2490_v50 = vadd.f32 %v1815_v38, %v1535_v11  ;;  %v2495_v9 = vadd.f32 %v1816_v35, %v1535_v11  ;;  %v2506_v5 = vadd.f32 %v1817_v20, %v1535_v11 }
0x1b34   :  { %v1550_v48 = vsel %vm700_vm15, %v2490_v50, -inf  ;;  %v1547_v33 = vsel %vm700_vm15, %v2495_v9, -inf  ;;  %v1553_v1 = vsel %vm707_vm14, %v2506_v5, -inf }
0x1b35   :  { %1551 = vmax.xlane.f32.xlu2 %v1550_v48  ;;  %1548 = vmax.xlane.f32.xlu0 %v1547_v33 }
0x1b38   :  { %1214 = vmin.xlane.f32.xlu1 %v1213_v2 }
0x1b3d   :  { %1554 = vmax.xlane.f32.xlu2 %v1553_v1 }
0x1b40   :  { %1363 = vmin.xlane.f32.xlu1 %v1362_v22 }
0x1b49   :  { %1618 = vperm.xlu0 %1738, %v1613_v27   ;;  %v1342_v27 = vcvt.s32.f32 %v1340_v56 }
0x1b4b   :  { %v1347_v52 = vsel %vm1346_vm2, %v1342_v27, inf }
0x1b51   :  { %1746 = vset.pattern.permute.xlu0 %v1821_v26 }
0x1b55   :  { %1657 = vperm.xlu2 %1743, %v1750_v21   ;;  %v2538_v21 = vpop.xlane.xlu2 %1478 }
0x1b56   :  { %vm1480_vm3 = vcmp.eq.f32.partialorder %v2452_v51, %v2538_v21 }
0x1b58   :  { %v2514_v42 = vpop.xlane.xlu0 %1448  ;;  %v2525_v39 = vpop.xlane.xlu1 %1240 }
0x1b59   :  { %vm1450_vm0 = vcmp.eq.f32.partialorder %v1447_v34, %v2514_v42  ;;  %vm1242_vm5 = vcmp.eq.f32.partialorder %v2468_v28, %v2525_v39  ;;  %v1459_v28 = vand.u32 65535, %v2439_v37 }
0x1b5a   :  { %v1451_v55 = vsel %vm1450_vm0, %v1446_v61, inf }
0x1b5b   :  { %1452 = vmin.xlane.f32.xlu1 %v1451_v55  ;;  %v1461_v40 = vcvt.s32.f32 %v1459_v28  ;;  %v1113_v55 = vcvt.f32.s32 %v2402_v58 }
0x1b5d   :  { %1745 = vset.pattern.permute.xlu2 %v1821_v26  ;;  %v1236_v26 = vand.u32 65535, %v2463_v19  ;;  %v1117_v19 = vand.u32 65535, %v2375_v13  ;;  %v1466_v3 = vsel %vm1465_vm11, %v1461_v40, inf  ;;  %v1625_v59 = vpop.permute.xlu2 %1624  ;;  %v1476_v13 = vcvt.s32.f32 %v1474_v17 }
0x1b5e   :  { %v1114_v43 = vshll.u32 %v1113_v55, 16  ;;  %v1351_v40 = vcvt.f32.s32 %v2434_v36  ;;  %v1366_v17 = vcvt.f32.s32 %v2479_v7 }
0x1b5f   :  { %v1238_v30 = vcvt.s32.f32 %v1236_v26  ;;  %v1481_v24 = vsel %vm1480_vm3, %v1476_v13, inf  ;;  %v1131_v26 = vperm.slane %v2393_v53, %v1926_v16 }
0x1b61   :  { %v1243_v23 = vsel %vm1242_vm5, %v1238_v30, inf  ;;  %v1232_v30 = vcvt.f32.s32 %v2477_v6 }
0x1b65   :  { %v1646_v0 = vpop.permute.xlu2 %1645 }
0x1b70   :  { %v1631_v10 = vpop.permute.xlu1 %1630 }
0x1b73   :  { %1110 = vmin.xlane.f32.xlu0 %v2406_v47  ;;  %v1325_v47 = vand.u32 65535, %v2385_v31  ;;  %v1119_v31 = vcvt.s32.f32 %v1117_v19  ;;  %v1233_v19 = vshll.u32 %v1232_v30, 16  ;;  %v1455_v30 = vcvt.f32.s32 %v2514_v42 }
0x1b75   :  { %v1327_v54 = vcvt.s32.f32 %v1325_v47  ;;  %v1124_v34 = vsel %vm1123_vm10, %v1119_v31, inf }
0x1b77   :  { %v1332_v60 = vsel %vm1331_vm6, %v1327_v54, inf  ;;  %v1217_v54 = vcvt.f32.s32 %v2417_v49 }
0x1b79   :  { %v1218_v28 = vshll.u32 %v1217_v54, 16 }
0x1b7b   :  { %1348 = vmin.xlane.f32.xlu0 %v1347_v52 }
0x1b7e   :  { %1229 = vmin.xlane.f32.xlu2 %v1228_v63 }
0x1b80   :  { %v1652_v14 = vpop.permute.xlu1 %1651 }
0x1b83   :  { %1244 = vmin.xlane.f32.xlu0 %v1243_v23 }
0x1b86   :  { %1333 = vmin.xlane.f32.xlu2 %v1332_v60 }
0x1b8e   :  { %1125 = vmin.xlane.f32.xlu2 %v1124_v34  ;;  %v1247_v34 = vcvt.f32.s32 %v2525_v39 }
0x1b96   :  { %1467 = vmin.xlane.f32.xlu2 %v1466_v3 }
0x1b9e   :  { %1482 = vmin.xlane.f32.xlu2 %v1481_v24 }
0x1ba8   :  { %v1552_v15 = vpop.xlane.xlu2 %1551  ;;  %v1549_v4 = vpop.xlane.xlu0 %1548 }
0x1ba9   :  { %vm1557_vm12 = vcmp.eq.f32.partialorder %v2490_v50, %v1552_v15  ;;  %vm1556_vm13 = vcmp.eq.f32.partialorder %v2495_v9, %v1549_v4  ;;  %v1636_v35 = vadd.f32 %v1625_v59, %v1552_v15  ;;  %v1336_v59 = vcvt.f32.s32 %v2432_v57 }
0x1baa   :  { %v1560_v37 = vsel %vm1557_vm12, %v1926_v16, 23  ;;  %v1559_v62 = vsel %vm1556_vm13, %v1926_v16, 23 }
0x1bab   :  { %v2551_v12 = vsel %vm700_vm15, %v1559_v62, 2147483647  ;;  %v2554_v51 = vsel %vm700_vm15, %v1560_v37, 2147483647  ;;  %v1663_v20 = vadd.f32 %v1652_v14, %v1636_v35  ;;  %v1215_v46 = vpop.xlane.xlu1 %1214  ;;  %v1367_v62 = vshll.u32 %v1366_v17, 16 }
0x1bac   :  { %v1579_v11 = vshra.s32 %v2554_v51, 16  ;;  %v1564_v32 = vshra.s32 %v2551_v12, 16  ;;  %v1216_v58 = vcvt.f32.s32 %v1215_v46  ;;  %v1128_v14 = vcvt.f32.s32 %v2430_v25 }
0x1bad   :  { %v1470_v46 = vcvt.f32.s32 %v2533_v8 }
0x1bae   :  { %v2558_v38 = vcvt.s32.f32 %v1579_v11  ;;  %v2560_v50 = vcvt.s32.f32 %v1564_v32  ;;  %v1219_v13 = vadd.s32 %v1218_v28, %v1216_v58  ;;  %v1337_v11 = vshll.u32 %v1336_v59, 16 }
0x1baf   :  { %v1471_v54 = vshll.u32 %v1470_v46, 16  ;;  %v1456_v58 = vshll.u32 %v1455_v30, 16 }
0x1bb0   :  { %v1555_v9 = vpop.xlane.xlu2 %1554  ;;  %1582 = vmin.xlane.f32.xlu0 %v2558_v38  ;;  %1567 = vmin.xlane.f32.xlu1 %v2560_v50  ;;  %v1250_v36 = vperm.slane %v1219_v13, %v1926_v16  ;;  %v1563_v13 = vand.u32 65535, %v2551_v12 }
0x1bb1   :  { %vm1558_vm1 = vcmp.eq.f32.partialorder %v2506_v5, %v1555_v9  ;;  %v1637_v48 = vadd.f32 %v1631_v10, %v1555_v9 }
0x1bb2   :  { %v1561_v33 = vsel %vm1558_vm1, %v1926_v16, 23 }
0x1bb3   :  { %v2567_v2 = vsel %vm707_vm14, %v1561_v33, 2147483647  ;;  %v1364_v3 = vpop.xlane.xlu1 %1363 }
0x1bb4   :  { %v1594_v41 = vshra.s32 %v2567_v2, 16  ;;  %v1365_v49 = vcvt.f32.s32 %v1364_v3 }
0x1bb6   :  { %1672 = vperm.xlu2 %1745, %v1663_v20   ;;  %v2570_v1 = vcvt.s32.f32 %v1594_v41  ;;  %v1368_v7 = vadd.s32 %v1367_v62, %v1365_v49 }
0x1bb8   :  { %v1658_v18 = vpop.permute.xlu2 %1657  ;;  %1597 = vmin.xlane.f32.xlu1 %v2570_v1 }
0x1bb9   :  { %v2573_v22 = vadd.f32 %v1658_v18, %v1637_v48  ;;  %v1372_v18 = vperm.slane %v1368_v7, %v2097_v45 }
0x1bbb   :  { %v1619_v29 = vpop.permute.xlu0 %1618 }
0x1bbc   :  { %v1635_v5 = vadd.f32 %v1619_v29, %v1549_v4  ;;  %v1352_v4 = vshll.u32 %v1351_v40, 16 }
0x1bbe   :  { %v2575_v61 = vadd.f32 %v1646_v0, %v1635_v5  ;;  %v1248_v0 = vshll.u32 %v1247_v34, 16 }
0x1be6   :  { %v1111_v56 = vpop.xlane.xlu0 %1110 }
0x1be7   :  { %v1112_v27 = vcvt.f32.s32 %v1111_v56  ;;  %v1129_v56 = vshll.u32 %v1128_v14, 16 }
0x1be9   :  { %v1115_v52 = vadd.s32 %v1114_v43, %v1112_v27 }
0x1beb   :  { %v1132_v63 = vperm.slane %v1115_v52, %v2094_v44 }
0x1bed   :  { %v1133_v47 = vsel %vm765_vm8, %v1132_v63, %v1131_v26  ;;  %v1453_v63 = vpop.xlane.xlu1 %1452 }
0x1bee   :  { %v1349_v23 = vpop.xlane.xlu0 %1348 }
0x1bef   :  { %v1350_v6 = vcvt.f32.s32 %v1349_v23 }
0x1bf1   :  { %v1230_v60 = vpop.xlane.xlu2 %1229  ;;  %v1353_v32 = vadd.s32 %v1352_v4, %v1350_v6 }
0x1bf2   :  { %v1231_v31 = vcvt.f32.s32 %v1230_v60  ;;  %v1454_v60 = vcvt.f32.s32 %v1453_v63 }
0x1bf3   :  { %v1370_v20 = vperm.slane %v1353_v32, %v2094_v44 }
0x1bf4   :  { %v1234_v53 = vadd.s32 %v1233_v19, %v1231_v31  ;;  %v1485_v19 = vcvt.f32.s32 %v2538_v21  ;;  %v1457_v34 = vadd.s32 %v1456_v58, %v1454_v60  ;;  %v1578_v21 = vand.u32 65535, %v2554_v51 }
0x1bf6   :  { %v1245_v24 = vpop.xlane.xlu0 %1244  ;;  %v1251_v37 = vperm.slane %v1234_v53, %v2094_v44  ;;  %v1486_v28 = vshll.u32 %v1485_v19, 16  ;;  %v1488_v53 = vperm.slane %v1457_v34, %v1926_v16  ;;  %v1580_v49 = vcvt.s32.f32 %v1578_v21 }
0x1bf7   :  { %v1246_v15 = vcvt.f32.s32 %v1245_v24 }
0x1bf8   :  { %v1252_v9 = vsel %vm765_vm8, %v1251_v37, %v1250_v36  ;;  %v1593_v37 = vand.u32 65535, %v2567_v2 }
0x1bf9   :  { %v1249_v39 = vadd.s32 %v1248_v0, %v1246_v15  ;;  %v1334_v10 = vpop.xlane.xlu2 %1333  ;;  %v1565_v0 = vcvt.s32.f32 %v1563_v13 }
0x1bfa   :  { %v1335_v35 = vcvt.f32.s32 %v1334_v10 }
0x1bfb   :  { %v1253_v57 = vperm.slane %v1249_v39, %v2097_v45  ;;  %v1595_v39 = vcvt.s32.f32 %v1593_v37 }
0x1bfc   :  { %v1338_v48 = vadd.s32 %v1337_v11, %v1335_v35 }
0x1bfd   :  { %v1254_v33 = vsel %vm769_vm9, %v1253_v57, %v1252_v9 }
0x1bfe   :  { %1255 = vst.msk [vmem:[%s2660_s10 + $0x4] sm:$0x1] %vm771_vm7, %v1254_v33  ;;  %v1369_v41 = vperm.slane %v1338_v48, %v1926_v16 }
0x1c00   :  { %v1371_v29 = vsel %vm765_vm8, %v1370_v20, %v1369_v41 }
0x1c01   :  { %v1373_v5 = vsel %vm769_vm9, %v1372_v18, %v1371_v29  ;;  %v1126_v55 = vpop.xlane.xlu2 %1125 }
0x1c02   :  { %1374 = vst.msk [vmem:[%s2660_s10 + $0x5] sm:$0x1] %vm771_vm7, %v1373_v5  ;;  %v1127_v25 = vcvt.f32.s32 %v1126_v55 }
0x1c04   :  { %v1130_v43 = vadd.s32 %v1129_v56, %v1127_v25 }
0x1c06   :  { %v1134_v27 = vperm.slane %v1130_v43, %v2097_v45 }
0x1c08   :  { %v1135_v52 = vsel %vm769_vm9, %v1134_v27, %v1133_v47 }
0x1c09   :  { %1136 = vst.msk [vmem:[%s2660_s10 + $0x3] sm:$0x1] %vm771_vm7, %v1135_v52  ;;  %v1468_v26 = vpop.xlane.xlu2 %1467 }
0x1c0a   :  { %v1469_v23 = vcvt.f32.s32 %v1468_v26 }
0x1c0c   :  { %v1472_v31 = vadd.s32 %v1471_v54, %v1469_v23 }
0x1c0e   :  { %v1489_v40 = vperm.slane %v1472_v31, %v2094_v44 }
0x1c10   :  { %v1490_v42 = vsel %vm765_vm8, %v1489_v40, %v1488_v53 }
0x1c11   :  { %v1483_v47 = vpop.xlane.xlu2 %1482 }
0x1c12   :  { %v1484_v8 = vcvt.f32.s32 %v1483_v47 }
0x1c14   :  { %v1487_v3 = vadd.s32 %v1486_v28, %v1484_v8 }
0x1c16   :  { %v1491_v17 = vperm.slane %v1487_v3, %v2097_v45 }
0x1c18   :  { %v1492_v59 = vsel %vm769_vm9, %v1491_v17, %v1490_v42 }
0x1c19   :  { %1493 = vst.msk [vmem:[%s2660_s10 + $0x6] sm:$0x1] %vm771_vm7, %v1492_v59  ;;  %v1673_v18 = vpop.permute.xlu2 %1672 }
0x1c1a   :  { %v1678_v55 = vperm.slane %v1673_v18, %v2094_v44 }
0x1c23   :  { %v1568_v6 = vpop.xlane.xlu1 %1567  ;;  %v1583_v24 = vpop.xlane.xlu0 %1582 }
0x1c24   :  { %vm1584_vm14 = vcmp.eq.f32.partialorder %v2558_v38, %v1583_v24  ;;  %vm1569_vm15 = vcmp.eq.f32.partialorder %v2560_v50, %v1568_v6  ;;  %v1574_v12 = vcvt.f32.s32 %v1568_v6  ;;  %v1589_v38 = vcvt.f32.s32 %v1583_v24 }
0x1c25   :  { %v1570_v15 = vsel %vm1569_vm15, %v1565_v0, inf  ;;  %v1585_v4 = vsel %vm1584_vm14, %v1580_v49, inf }
0x1c26   :  { %1571 = vmin.xlane.f32.xlu0 %v1570_v15  ;;  %1586 = vmin.xlane.f32.xlu1 %v1585_v4  ;;  %v1575_v32 = vshll.u32 %v1574_v12, 16  ;;  %v1590_v35 = vshll.u32 %v1589_v38, 16 }
0x1c2b   :  { %v1598_v62 = vpop.xlane.xlu1 %1597 }
0x1c2c   :  { %vm1599_vm0 = vcmp.eq.f32.partialorder %v2570_v1, %v1598_v62  ;;  %v1604_v7 = vcvt.f32.s32 %v1598_v62 }
0x1c2d   :  { %v1600_v51 = vsel %vm1599_vm0, %v1595_v39, inf }
0x1c2e   :  { %1601 = vmin.xlane.f32.xlu0 %v1600_v51  ;;  %v1605_v48 = vshll.u32 %v1604_v7, 16 }
0x1c3f   :  { %1669 = vperm.xlu1 %1744, %v2575_v61  }
0x1c42   :  { %1675 = vperm.xlu0 %1746, %v2573_v22  }
0x1c99   :  { %v1587_v10 = vpop.xlane.xlu1 %1586  ;;  %v1572_v50 = vpop.xlane.xlu0 %1571 }
0x1c9a   :  { %v1588_v11 = vcvt.f32.s32 %v1587_v10  ;;  %v1573_v36 = vcvt.f32.s32 %v1572_v50 }
0x1c9c   :  { %v1591_v2 = vadd.s32 %v1590_v35, %v1588_v11  ;;  %v1576_v57 = vadd.s32 %v1575_v32, %v1573_v36 }
0x1c9e   :  { %v1608_v33 = vperm.slane %v1591_v2, %v2094_v44  ;;  %v1607_v61 = vperm.slane %v1576_v57, %v1926_v16 }
0x1ca0   :  { %v1609_v20 = vsel %vm765_vm8, %v1608_v33, %v1607_v61 }
0x1ca1   :  { %v1602_v9 = vpop.xlane.xlu0 %1601 }
0x1ca2   :  { %v1603_v1 = vcvt.f32.s32 %v1602_v9 }
0x1ca4   :  { %v1606_v14 = vadd.s32 %v1605_v48, %v1603_v1 }
0x1ca6   :  { %v1610_v22 = vperm.slane %v1606_v14, %v2097_v45 }
0x1ca8   :  { %v1611_v41 = vsel %vm769_vm9, %v1610_v22, %v1609_v20 }
0x1ca9   :  { %1612 = vst.msk [vmem:[%s2660_s10 + $0x7] sm:$0x1] %vm771_vm7, %v1611_v41 }
0x1cb1   :  { %v1670_v29 = vpop.permute.xlu1 %1669 }
0x1cb2   :  { %v1677_v5 = vperm.slane %v1670_v29, %v1926_v16 }
0x1cb4   :  { %v1676_v56 = vpop.permute.xlu0 %1675  ;;  %v1679_v43 = vsel %vm765_vm8, %v1678_v55, %v1677_v5 }
0x1cb5   :  { %v1680_v25 = vperm.slane %v1676_v56, %v2097_v45 }
0x1cb7   :  { %v1681_v27 = vsel %vm769_vm9, %v1680_v25, %v1679_v43 }
0x1cb8   :  { %1683 = vst.msk [vmem:[%s2662_s11] sm:$0x1] %vm771_vm7, %v1681_v27 }

</bundles_post_ra>
